<compile_context>
chip_gen: v7x
topology: tpu7x:2x2x1
jax: 0.10.0
libtpu: 0.0.40
codegen_flags: <defaults>
</compile_context>

<pallas_src>
import functools

import jax
import jax.numpy as jnp
from jax import lax
from jax.experimental import pallas as pl
from jax.experimental.pallas import tpu as pltpu


def _round_up(x, m):
    return ((x + m - 1) // m) * m


# ----------------------------------------------------------------------------
# Pallas kernel: full forward pass on one packed (block-diagonal) graph batch.
# ----------------------------------------------------------------------------
def _kspace_encoder_kernel(adj_ref, x_ref,
                           w1_ref, g1_ref, be1_ref,
                           w2_ref, g2_ref, be2_ref,
                           w3_ref, g3_ref, be3_ref,
                           pool_ref, out_ref, *, inv_n):
    num_graphs, n_pad, _ = adj_ref.shape
    adj = adj_ref[...]                      # (G, n, n) bf16 block-diagonal Ahat blocks
    h = x_ref[...]                          # (G, n, D_in) f32; padded rows are exact zeros

    def gcn_bn_relu(h, w_ref, g_ref, be_ref):
        # GCNConv, propagate first:  (Ahat @ H) @ W — associative with the PyTorch
        # Ahat @ (H W) but runs the n^2 matmul at the cheaper feature width.
        t = jnp.einsum("gij,gjd->gid", adj, h.astype(jnp.bfloat16),
                       preferred_element_type=jnp.float32)               # MXU bf16 -> f32
        d_in = t.shape[-1]
        t2 = t.reshape(num_graphs * n_pad, d_in).astype(jnp.bfloat16)
        z = jnp.dot(t2, w_ref[...], preferred_element_type=jnp.float32)   # (G*n, D_out) f32
        # GCN bias intentionally omitted: a per-feature constant is cancelled exactly by
        # the train-mode BatchNorm mean subtraction below.
        # BatchNorm1d (training mode, eps=1e-5) fused into a single scale/shift.
        # Padded node rows of z are exact zeros (zero adjacency rows), so plain sums with
        # the true-node-count denominator give the correct cross-graph statistics.
        s = jnp.sum(z, axis=0, keepdims=True)                  # (1, D_out)
        ss = jnp.sum(z * z, axis=0, keepdims=True)             # (1, D_out)
        mean = s * inv_n
        var = ss * inv_n - mean * mean
        scale = g_ref[...] * lax.rsqrt(var + 1e-5)             # (1, D_out)
        shift = be_ref[...] - mean * scale
        z = jnp.maximum(z * scale + shift, 0.0)                # fused BN affine + ReLU
        return z.reshape(num_graphs, n_pad, -1)                # (G, n, D_out) f32

    h = gcn_bn_relu(h, w1_ref, g1_ref, be1_ref)
    h = gcn_bn_relu(h, w2_ref, g2_ref, be2_ref)
    h = gcn_bn_relu(h, w3_ref, g3_ref, be3_ref)

    # global_mean_pool: per-graph mean over valid nodes (pool weight is 0 on padding).
    out_ref[...] = jnp.sum(h * pool_ref[...], axis=1)          # (G, D_out)


# ----------------------------------------------------------------------------
# Plain-JAX glue: pack the PyG-style batch into per-graph blocks.
# ----------------------------------------------------------------------------
def build_graph_blocks(x, edge_index, batch, num_graphs, n_pad):
    """Per-graph normalized adjacency Ahat = D^-1/2 (A+I) D^-1/2, padded node features
    and mean-pool weights.  O(G * n_pad^2) memory — never the dense (N, N) matrix.
    Assumes nodes of each graph are contiguous (standard PyG batching)."""
    num_nodes = x.shape[0]
    counts = jnp.zeros((num_graphs,), jnp.float32).at[batch].add(1.0)       # nodes per graph
    starts = jnp.concatenate(
        [jnp.zeros((1,), jnp.int32), jnp.cumsum(counts.astype(jnp.int32))[:-1]])
    local = jnp.arange(num_nodes, dtype=jnp.int32) - starts[batch]          # index in graph

    src, dst = edge_index[0], edge_index[1]
    adj = jnp.zeros((num_graphs, n_pad, n_pad), jnp.float32)
    adj = adj.at[batch[dst], local[dst], local[src]].set(1.0)   # message flows src -> dst
    adj = adj.at[batch, local, local].add(1.0)                  # add self loops
    deg = jnp.sum(adj, axis=2)                                  # (G, n_pad)
    dinv = jnp.where(deg > 0.0, lax.rsqrt(jnp.maximum(deg, 1e-12)), 0.0)
    adj = adj * dinv[:, :, None] * dinv[:, None, :]

    xb = jnp.zeros((num_graphs, n_pad, x.shape[1]), jnp.float32).at[batch, local].set(x)

    pool = jnp.zeros((num_graphs, n_pad), jnp.float32).at[batch, local].set(1.0)
    pool = pool / jnp.maximum(counts[:, None], 1.0)
    return adj, xb, pool[:, :, None]


def init_params(key, node_dim, out_dim):
    """Synthetic weights (glorot-ish).  BN gamma=1, beta=0 (PyTorch defaults)."""
    keys = jax.random.split(key, 6)

    def glorot(k, fan_in, fan_out):
        scale = jnp.sqrt(6.0 / (fan_in + fan_out))
        return jax.random.uniform(k, (fan_in, fan_out), jnp.float32, -scale, scale)

    params = {}
    dims = [(node_dim, out_dim), (out_dim, out_dim), (out_dim, out_dim)]
    for i, (fi, fo) in enumerate(dims, start=1):
        params[f"w{i}"] = glorot(keys[2 * (i - 1)], fi, fo)
        params[f"b{i}"] = 0.01 * jax.random.normal(keys[2 * (i - 1) + 1], (1, fo), jnp.float32)
        params[f"g{i}"] = jnp.ones((1, fo), jnp.float32)     # BN weight
        params[f"be{i}"] = jnp.zeros((1, fo), jnp.float32)   # BN bias
    return params


@functools.partial(jax.jit, static_argnames=("num_graphs", "n_pad"))
def _forward_impl(x, edge_index, batch, params, num_graphs, n_pad):
    num_nodes, node_dim = x.shape
    out_dim = params["w1"].shape[1]
    d_pad = _round_up(out_dim, 128)                      # lane-dense feature width

    adj, xb, pool = build_graph_blocks(x.astype(jnp.float32), edge_index, batch,
                                       num_graphs, n_pad)
    adj = adj.astype(jnp.bfloat16)                       # bf16 MXU inputs, f32 accumulation

    pad_o = d_pad - out_dim
    w1 = jnp.pad(params["w1"], ((0, 0), (0, pad_o))).astype(jnp.bfloat16)
    w2 = jnp.pad(params["w2"], ((0, pad_o), (0, pad_o))).astype(jnp.bfloat16)
    w3 = jnp.pad(params["w3"], ((0, pad_o), (0, pad_o))).astype(jnp.bfloat16)

    def pad_aff(v):                                      # (1, out_dim) -> (1, d_pad)
        return jnp.pad(v.astype(jnp.float32), ((0, 0), (0, pad_o)))

    g1, be1 = pad_aff(params["g1"]), pad_aff(params["be1"])
    g2, be2 = pad_aff(params["g2"]), pad_aff(params["be2"])
    g3, be3 = pad_aff(params["g3"]), pad_aff(params["be3"])
    # conv biases b1/b2/b3 are intentionally NOT passed: train-mode BN cancels them.

    operands = (adj, xb, w1, g1, be1, w2, g2, be2, w3, g3, be3, pool)

    # Advisory cost estimate so XLA schedules the custom call sensibly.
    flops = 0
    for d_in in (node_dim, d_pad, d_pad):
        flops += 2 * num_graphs * n_pad * n_pad * d_in            # propagate (block-diag)
        flops += 2 * num_graphs * n_pad * d_in * d_pad            # feature transform
    flops += 2 * num_graphs * n_pad * d_pad                       # pooling
    operand_bytes = sum(int(o.size) * o.dtype.itemsize for o in operands)
    out_bytes = num_graphs * d_pad * 4
    act_bytes = 4 * num_graphs * n_pad * d_pad * 4                # f32 activation temporaries
    vmem_limit = int(min(max(2 * operand_bytes + act_bytes + (1 << 20), 16 * 2**20),
                         56 * 2**20))                             # stays under v7x's 64 MiB

    vmem = pl.BlockSpec(memory_space=pltpu.MemorySpace.VMEM)
    kernel = functools.partial(_kspace_encoder_kernel, inv_n=1.0 / num_nodes)

    out = pl.pallas_call(
        kernel,
        out_shape=jax.ShapeDtypeStruct((num_graphs, d_pad), jnp.float32),
        in_specs=[vmem] * len(operands),
        out_specs=vmem,
        compiler_params=pltpu.CompilerParams(vmem_limit_bytes=vmem_limit),
        cost_estimate=pl.CostEstimate(flops=flops, transcendentals=3 * d_pad,
                                      bytes_accessed=operand_bytes + out_bytes),
    )(*operands)
    return out[:, :out_dim]


def kspace_encoder_forward(x, edge_index, edge_attr, batch, params, num_graphs):
    # edge_attr is accepted for interface parity; the PyTorch forward calls GCNConv
    # without it, so it is unused.
    del edge_attr
    # Static packing geometry (PyG batches have contiguous nodes per graph).
    n_max = int(jnp.max(jnp.bincount(batch, length=num_graphs)))
    n_pad = _round_up(max(n_max, 1), 128)   # 128-aligned node blocks -> full MXU tiles
    # TODO(synk): for batches where G * n_pad^2 no longer fits VMEM (v7x: 64 MiB), stream
    # the adjacency blocks with a graph-axis grid ("parallel" across the 2 TCs) and compute
    # the cross-graph BatchNorm statistics in a second pass.
    return _forward_impl(x, edge_index, batch, params, num_graphs, n_pad)


# ----------------------------------------------------------------------------
# Pure-JAX reference (dense adjacency) mirroring the kernel's bf16 matmul inputs.
# ----------------------------------------------------------------------------
def reference_forward(x, edge_index, batch, params, num_graphs):
    n = x.shape[0]
    a = jnp.zeros((n, n), jnp.float32).at[edge_index[1], edge_index[0]].set(1.0)
    a = a + jnp.eye(n, dtype=jnp.float32)
    dinv = lax.rsqrt(jnp.maximum(jnp.sum(a, axis=1), 1e-12))
    a = (a * dinv[:, None] * dinv[None, :]).astype(jnp.bfloat16)
    h = x.astype(jnp.float32)
    for i in (1, 2, 3):
        t = jnp.dot(a, h.astype(jnp.bfloat16), preferred_element_type=jnp.float32)
        h = jnp.dot(t.astype(jnp.bfloat16), params[f"w{i}"].astype(jnp.bfloat16),
                    preferred_element_type=jnp.float32) + params[f"b{i}"]
        mean = h.mean(0, keepdims=True)
        var = ((h - mean) ** 2).mean(0, keepdims=True)
        h = (h - mean) * lax.rsqrt(var + 1e-5) * params[f"g{i}"] + params[f"be{i}"]
        h = jnp.maximum(h, 0.0)
    pool = (batch[None, :] == jnp.arange(num_graphs)[:, None]).astype(jnp.float32)
    pool = pool / jnp.maximum(pool.sum(1, keepdims=True), 1.0)
    return pool @ h


if __name__ == "__main__":
    key = jax.random.PRNGKey(0)
    k_x, k_p, k_e = jax.random.split(key, 3)

    # Small deterministic problem: 2 graphs, 8 nodes each, node_dim=16, edge_dim=4, out_dim=64.
    node_dim, edge_dim, out_dim = 16, 4, 64
    num_graphs, nodes_per_graph = 2, 8
    num_nodes = num_graphs * nodes_per_graph

    x = jax.random.normal(k_x, (num_nodes, node_dim), jnp.float32)

    # Undirected ring within each graph (both directions listed, as PyG expects).
    src_list, dst_list = [], []
    for g in range(num_graphs):
        base = g * nodes_per_graph
        for n in range(nodes_per_graph):
            a, b = base + n, base + (n + 1) % nodes_per_graph
            src_list += [a, b]
            dst_list += [b, a]
    edge_index = jnp.array([src_list, dst_list], dtype=jnp.int32)      # (2, 32)
    edge_attr = jax.random.normal(k_e, (edge_index.shape[1], edge_dim), jnp.float32)
    batch = jnp.repeat(jnp.arange(num_graphs, dtype=jnp.int32), nodes_per_graph)

    params = init_params(k_p, node_dim, out_dim)

    out = kspace_encoder_forward(x, edge_index, edge_attr, batch, params, num_graphs)
    out = jax.block_until_ready(out)

    ref = reference_forward(x, edge_index, batch, params, num_graphs)
    assert out.shape == (num_graphs, out_dim)
    # bf16 MXU inputs (kernel and reference both use them); the conv bias is present in the
    # reference but cancelled by train-mode BN, so results agree to well within 2e-3.
    assert jnp.allclose(out, ref, atol=2e-3, rtol=2e-3), "mismatch vs reference"

    print("KERNEL_OK")
</pallas_src>

<mosaic_0001>
module attributes {stable_mosaic.version = 11 : i64} {
  func.func private @main(%arg0: i32) attributes {dimension_semantics = [#tpu.dimension_semantics<core_parallel>], iteration_bounds = array<i64: 2>, tpu.core_type = #tpu.core_type<sc_scalar_subcore>, window_params = []} {
    return
  }
}

module attributes {stable_mosaic.version = 11 : i64} {
  func.func private @main(%arg0: i32) attributes {dimension_semantics = [#tpu.dimension_semantics<core_parallel>], iteration_bounds = array<i64: 2>, tpu.core_type = #tpu.core_type<sc_scalar_subcore>, window_params = []} {
    return
  }
}

module attributes {stable_mosaic.version = 11 : i64} {
  func.func @_kspace_encoder_kernel(%arg0: memref<2x128x128xbf16, #tpu.memory_space<vmem>>, %arg1: memref<2x128x16xf32, #tpu.memory_space<vmem>>, %arg2: memref<16x128xbf16, #tpu.memory_space<vmem>>, %arg3: memref<1x128xf32, #tpu.memory_space<vmem>>, %arg4: memref<1x128xf32, #tpu.memory_space<vmem>>, %arg5: memref<128x128xbf16, #tpu.memory_space<vmem>>, %arg6: memref<1x128xf32, #tpu.memory_space<vmem>>, %arg7: memref<1x128xf32, #tpu.memory_space<vmem>>, %arg8: memref<128x128xbf16, #tpu.memory_space<vmem>>, %arg9: memref<1x128xf32, #tpu.memory_space<vmem>>, %arg10: memref<1x128xf32, #tpu.memory_space<vmem>>, %arg11: memref<2x128x1xf32, #tpu.memory_space<vmem>>, %arg12: memref<2x128xf32, #tpu.memory_space<vmem>>) attributes {dimension_semantics = [], scalar_prefetch = 0 : i64, scratch_operands = 0 : i64, tpu.core_type = #tpu.core_type<tc>} {
    %c0 = arith.constant 0 : index
    %c0_0 = arith.constant 0 : index
    %c0_1 = arith.constant 0 : index
    %0 = vector.load %arg0[%c0, %c0_0, %c0_1] : memref<2x128x128xbf16, #tpu.memory_space<vmem>>, vector<2x128x128xbf16>
    %c0_2 = arith.constant 0 : index
    %c0_3 = arith.constant 0 : index
    %c0_4 = arith.constant 0 : index
    %1 = vector.load %arg1[%c0_2, %c0_3, %c0_4] : memref<2x128x16xf32, #tpu.memory_space<vmem>>, vector<2x128x16xf32>
    %2 = arith.truncf %1 : vector<2x128x16xf32> to vector<2x128x16xbf16>
    "tpu.trace_start"() <{level = 10 : i32, message = "gij,gjd->gid"}> : () -> ()
    %cst = arith.constant dense<0.000000e+00> : vector<2x128x16xf32>
    %3 = tpu.matmul %0, %2, %cst {dimension_numbers = #tpu.dot_dimension_numbers<[2], [1], [1], [2], [0, 0, 0, 1, 1, 2], [0], [0]>} : vector<2x128x128xbf16>, vector<2x128x16xbf16>, vector<2x128x16xf32> -> vector<2x128x16xf32>
    "tpu.trace_stop"() : () -> ()
    %4 = vector.shape_cast %3 : vector<2x128x16xf32> to vector<256x16xf32>
    %5 = arith.truncf %4 : vector<256x16xf32> to vector<256x16xbf16>
    %c0_5 = arith.constant 0 : index
    %c0_6 = arith.constant 0 : index
    %6 = vector.load %arg2[%c0_5, %c0_6] : memref<16x128xbf16, #tpu.memory_space<vmem>>, vector<16x128xbf16>
    %cst_7 = arith.constant dense<0.000000e+00> : vector<256x128xf32>
    %7 = tpu.matmul %5, %6, %cst_7 {dimension_numbers = #tpu.dot_dimension_numbers<[1], [0], [0], [1], [0, 0, 1, 1], [], []>} : vector<256x16xbf16>, vector<16x128xbf16>, vector<256x128xf32> -> vector<256x128xf32>
    %cst_8 = arith.constant dense<0.000000e+00> : vector<128xf32>
    %8 = vector.multi_reduction <add>, %7, %cst_8 [0] : vector<256x128xf32> to vector<128xf32>
    %9 = vector.shape_cast %8 : vector<128xf32> to vector<1x128xf32>
    %10 = arith.mulf %7, %7 : vector<256x128xf32>
    %cst_9 = arith.constant dense<0.000000e+00> : vector<128xf32>
    %11 = vector.multi_reduction <add>, %10, %cst_9 [0] : vector<256x128xf32> to vector<128xf32>
    %12 = vector.shape_cast %11 : vector<128xf32> to vector<1x128xf32>
    %cst_10 = arith.constant 6.250000e-02 : f32
    %13 = vector.broadcast %cst_10 : f32 to vector<1x128xf32>
    %14 = arith.mulf %9, %13 : vector<1x128xf32>
    %cst_11 = arith.constant 6.250000e-02 : f32
    %15 = vector.broadcast %cst_11 : f32 to vector<1x128xf32>
    %16 = arith.mulf %12, %15 : vector<1x128xf32>
    %17 = arith.mulf %14, %14 : vector<1x128xf32>
    %18 = arith.subf %16, %17 : vector<1x128xf32>
    %c0_12 = arith.constant 0 : index
    %c0_13 = arith.constant 0 : index
    %19 = vector.load %arg3[%c0_12, %c0_13] : memref<1x128xf32, #tpu.memory_space<vmem>>, vector<1x128xf32>
    %cst_14 = arith.constant 9.99999974E-6 : f32
    %20 = vector.broadcast %cst_14 : f32 to vector<1x128xf32>
    %21 = arith.addf %18, %20 : vector<1x128xf32>
    %22 = math.rsqrt %21 : vector<1x128xf32>
    %23 = arith.mulf %19, %22 : vector<1x128xf32>
    %c0_15 = arith.constant 0 : index
    %c0_16 = arith.constant 0 : index
    %24 = vector.load %arg4[%c0_15, %c0_16] : memref<1x128xf32, #tpu.memory_space<vmem>>, vector<1x128xf32>
    %25 = arith.mulf %14, %23 : vector<1x128xf32>
    %26 = arith.subf %24, %25 : vector<1x128xf32>
    %27 = vector.broadcast %23 : vector<1x128xf32> to vector<256x128xf32>
    %28 = arith.mulf %7, %27 : vector<256x128xf32>
    %29 = vector.broadcast %26 : vector<1x128xf32> to vector<256x128xf32>
    %30 = arith.addf %28, %29 : vector<256x128xf32>
    %cst_17 = arith.constant 0.000000e+00 : f32
    %31 = vector.broadcast %cst_17 : f32 to vector<256x128xf32>
    %32 = arith.maximumf %30, %31 : vector<256x128xf32>
    %33 = vector.shape_cast %32 : vector<256x128xf32> to vector<2x128x128xf32>
    %34 = arith.truncf %33 : vector<2x128x128xf32> to vector<2x128x128xbf16>
    "tpu.trace_start"() <{level = 10 : i32, message = "gij,gjd->gid"}> : () -> ()
    %cst_18 = arith.constant dense<0.000000e+00> : vector<2x128x128xf32>
    %35 = tpu.matmul %0, %34, %cst_18 {dimension_numbers = #tpu.dot_dimension_numbers<[2], [1], [1], [2], [0, 0, 0, 1, 1, 2], [0], [0]>} : vector<2x128x128xbf16>, vector<2x128x128xbf16>, vector<2x128x128xf32> -> vector<2x128x128xf32>
    "tpu.trace_stop"() : () -> ()
    %36 = vector.shape_cast %35 : vector<2x128x128xf32> to vector<256x128xf32>
    %37 = arith.truncf %36 : vector<256x128xf32> to vector<256x128xbf16>
    %c0_19 = arith.constant 0 : index
    %c0_20 = arith.constant 0 : index
    %38 = vector.load %arg5[%c0_19, %c0_20] : memref<128x128xbf16, #tpu.memory_space<vmem>>, vector<128x128xbf16>
    %cst_21 = arith.constant dense<0.000000e+00> : vector<256x128xf32>
    %39 = tpu.matmul %37, %38, %cst_21 {dimension_numbers = #tpu.dot_dimension_numbers<[1], [0], [0], [1], [0, 0, 1, 1], [], []>} : vector<256x128xbf16>, vector<128x128xbf16>, vector<256x128xf32> -> vector<256x128xf32>
    %cst_22 = arith.constant dense<0.000000e+00> : vector<128xf32>
    %40 = vector.multi_reduction <add>, %39, %cst_22 [0] : vector<256x128xf32> to vector<128xf32>
    %41 = vector.shape_cast %40 : vector<128xf32> to vector<1x128xf32>
    %42 = arith.mulf %39, %39 : vector<256x128xf32>
    %cst_23 = arith.constant dense<0.000000e+00> : vector<128xf32>
    %43 = vector.multi_reduction <add>, %42, %cst_23 [0] : vector<256x128xf32> to vector<128xf32>
    %44 = vector.shape_cast %43 : vector<128xf32> to vector<1x128xf32>
    %cst_24 = arith.constant 6.250000e-02 : f32
    %45 = vector.broadcast %cst_24 : f32 to vector<1x128xf32>
    %46 = arith.mulf %41, %45 : vector<1x128xf32>
    %cst_25 = arith.constant 6.250000e-02 : f32
    %47 = vector.broadcast %cst_25 : f32 to vector<1x128xf32>
    %48 = arith.mulf %44, %47 : vector<1x128xf32>
    %49 = arith.mulf %46, %46 : vector<1x128xf32>
    %50 = arith.subf %48, %49 : vector<1x128xf32>
    %c0_26 = arith.constant 0 : index
    %c0_27 = arith.constant 0 : index
    %51 = vector.load %arg6[%c0_26, %c0_27] : memref<1x128xf32, #tpu.memory_space<vmem>>, vector<1x128xf32>
    %cst_28 = arith.constant 9.99999974E-6 : f32
    %52 = vector.broadcast %cst_28 : f32 to vector<1x128xf32>
    %53 = arith.addf %50, %52 : vector<1x128xf32>
    %54 = math.rsqrt %53 : vector<1x128xf32>
    %55 = arith.mulf %51, %54 : vector<1x128xf32>
    %c0_29 = arith.constant 0 : index
    %c0_30 = arith.constant 0 : index
    %56 = vector.load %arg7[%c0_29, %c0_30] : memref<1x128xf32, #tpu.memory_space<vmem>>, vector<1x128xf32>
    %57 = arith.mulf %46, %55 : vector<1x128xf32>
    %58 = arith.subf %56, %57 : vector<1x128xf32>
    %59 = vector.broadcast %55 : vector<1x128xf32> to vector<256x128xf32>
    %60 = arith.mulf %39, %59 : vector<256x128xf32>
    %61 = vector.broadcast %58 : vector<1x128xf32> to vector<256x128xf32>
    %62 = arith.addf %60, %61 : vector<256x128xf32>
    %cst_31 = arith.constant 0.000000e+00 : f32
    %63 = vector.broadcast %cst_31 : f32 to vector<256x128xf32>
    %64 = arith.maximumf %62, %63 : vector<256x128xf32>
    %65 = vector.shape_cast %64 : vector<256x128xf32> to vector<2x128x128xf32>
    %66 = arith.truncf %65 : vector<2x128x128xf32> to vector<2x128x128xbf16>
    "tpu.trace_start"() <{level = 10 : i32, message = "gij,gjd->gid"}> : () -> ()
    %cst_32 = arith.constant dense<0.000000e+00> : vector<2x128x128xf32>
    %67 = tpu.matmul %0, %66, %cst_32 {dimension_numbers = #tpu.dot_dimension_numbers<[2], [1], [1], [2], [0, 0, 0, 1, 1, 2], [0], [0]>} : vector<2x128x128xbf16>, vector<2x128x128xbf16>, vector<2x128x128xf32> -> vector<2x128x128xf32>
    "tpu.trace_stop"() : () -> ()
    %68 = vector.shape_cast %67 : vector<2x128x128xf32> to vector<256x128xf32>
    %69 = arith.truncf %68 : vector<256x128xf32> to vector<256x128xbf16>
    %c0_33 = arith.constant 0 : index
    %c0_34 = arith.constant 0 : index
    %70 = vector.load %arg8[%c0_33, %c0_34] : memref<128x128xbf16, #tpu.memory_space<vmem>>, vector<128x128xbf16>
    %cst_35 = arith.constant dense<0.000000e+00> : vector<256x128xf32>
    %71 = tpu.matmul %69, %70, %cst_35 {dimension_numbers = #tpu.dot_dimension_numbers<[1], [0], [0], [1], [0, 0, 1, 1], [], []>} : vector<256x128xbf16>, vector<128x128xbf16>, vector<256x128xf32> -> vector<256x128xf32>
    %cst_36 = arith.constant dense<0.000000e+00> : vector<128xf32>
    %72 = vector.multi_reduction <add>, %71, %cst_36 [0] : vector<256x128xf32> to vector<128xf32>
    %73 = vector.shape_cast %72 : vector<128xf32> to vector<1x128xf32>
    %74 = arith.mulf %71, %71 : vector<256x128xf32>
    %cst_37 = arith.constant dense<0.000000e+00> : vector<128xf32>
    %75 = vector.multi_reduction <add>, %74, %cst_37 [0] : vector<256x128xf32> to vector<128xf32>
    %76 = vector.shape_cast %75 : vector<128xf32> to vector<1x128xf32>
    %cst_38 = arith.constant 6.250000e-02 : f32
    %77 = vector.broadcast %cst_38 : f32 to vector<1x128xf32>
    %78 = arith.mulf %73, %77 : vector<1x128xf32>
    %cst_39 = arith.constant 6.250000e-02 : f32
    %79 = vector.broadcast %cst_39 : f32 to vector<1x128xf32>
    %80 = arith.mulf %76, %79 : vector<1x128xf32>
    %81 = arith.mulf %78, %78 : vector<1x128xf32>
    %82 = arith.subf %80, %81 : vector<1x128xf32>
    %c0_40 = arith.constant 0 : index
    %c0_41 = arith.constant 0 : index
    %83 = vector.load %arg9[%c0_40, %c0_41] : memref<1x128xf32, #tpu.memory_space<vmem>>, vector<1x128xf32>
    %cst_42 = arith.constant 9.99999974E-6 : f32
    %84 = vector.broadcast %cst_42 : f32 to vector<1x128xf32>
    %85 = arith.addf %82, %84 : vector<1x128xf32>
    %86 = math.rsqrt %85 : vector<1x128xf32>
    %87 = arith.mulf %83, %86 : vector<1x128xf32>
    %c0_43 = arith.constant 0 : index
    %c0_44 = arith.constant 0 : index
    %88 = vector.load %arg10[%c0_43, %c0_44] : memref<1x128xf32, #tpu.memory_space<vmem>>, vector<1x128xf32>
    %89 = arith.mulf %78, %87 : vector<1x128xf32>
    %90 = arith.subf %88, %89 : vector<1x128xf32>
    %91 = vector.broadcast %87 : vector<1x128xf32> to vector<256x128xf32>
    %92 = arith.mulf %71, %91 : vector<256x128xf32>
    %93 = vector.broadcast %90 : vector<1x128xf32> to vector<256x128xf32>
    %94 = arith.addf %92, %93 : vector<256x128xf32>
    %cst_45 = arith.constant 0.000000e+00 : f32
    %95 = vector.broadcast %cst_45 : f32 to vector<256x128xf32>
    %96 = arith.maximumf %94, %95 : vector<256x128xf32>
    %97 = vector.shape_cast %96 : vector<256x128xf32> to vector<2x128x128xf32>
    %c0_46 = arith.constant 0 : index
    %c0_47 = arith.constant 0 : index
    %c0_48 = arith.constant 0 : index
    %98 = vector.load %arg11[%c0_46, %c0_47, %c0_48] : memref<2x128x1xf32, #tpu.memory_space<vmem>>, vector<2x128x1xf32>
    %99 = vector.broadcast %98 : vector<2x128x1xf32> to vector<2x128x128xf32>
    %100 = arith.mulf %97, %99 : vector<2x128x128xf32>
    %cst_49 = arith.constant dense<0.000000e+00> : vector<2x128xf32>
    %101 = vector.multi_reduction <add>, %100, %cst_49 [1] : vector<2x128x128xf32> to vector<2x128xf32>
    %c0_50 = arith.constant 0 : index
    %c0_51 = arith.constant 0 : index
    %102 = vector.load %arg12[%c0_50, %c0_51] : memref<2x128xf32, #tpu.memory_space<vmem>>, vector<2x128xf32>
    tpu.vector_store %arg12[%c0_50, %c0_51], %101 {strides = array<i32>} : memref<2x128xf32, #tpu.memory_space<vmem>>, vector<2x128xf32>,
    return
  }
}

</mosaic_0001>

<bundles_post_ra>
// kernel: _forward_impl.1
= control target key start
LH: loop header
LB: loop body
LE: loop exit
PB: predicated region body
PF: predicated region fallthrough
CT: control target
= control target key end

     0   :  { %s4444_s0 = inlined_call_operand.vmem [shape: bf16[2,128,128], index: 0, kind: input, shape index: {}]   ;;  %s4445_s1 = inlined_call_operand.vmem [shape: f32[2,128,16], index: 1, kind: input, shape index: {}]   ;;  %s4446_s2 = inlined_call_operand.vmem [shape: bf16[16,128], index: 2, kind: input, shape index: {}]   ;;  %s4447_s3 = inlined_call_operand.vmem [shape: f32[1,128], index: 3, kind: input, shape index: {}]   ;;  %s4448_s4 = inlined_call_operand.vmem [shape: f32[1,128], index: 4, kind: input, shape index: {}]   ;;  %s4449_s5 = inlined_call_operand.vmem [shape: bf16[128,128], index: 5, kind: input, shape index: {}]   ;;  %s4450_s6 = inlined_call_operand.vmem [shape: f32[1,128], index: 6, kind: input, shape index: {}]   ;;  %s4451_s7 = inlined_call_operand.vmem [shape: f32[1,128], index: 7, kind: input, shape index: {}]   ;;  %s4452_s8 = inlined_call_operand.vmem [shape: bf16[128,128], index: 8, kind: input, shape index: {}]   ;;  %s4453_s9 = inlined_call_operand.vmem [shape: f32[1,128], index: 9, kind: input, shape index: {}]   ;;  %s4454_s10 = inlined_call_operand.vmem [shape: f32[1,128], index: 10, kind: input, shape index: {}]   ;;  %s4455_s11 = inlined_call_operand.vmem [shape: f32[2,128,1], index: 11, kind: input, shape index: {}]   ;;  %s4456_s12 = inlined_call_operand.hbm [shape: f32[2,128], index: 12, kind: output, shape index: {}]  }
   0x1   :  { %v75_v0 = vld [vmem:[%s4445_s1] sm:$0xff]  ;;  %v76_v1 = vld [vmem:[%s4445_s1 + $0x8] sm:$0xff]  ;;  %v77_v2 = vld [vmem:[%s4445_s1 + $0x10] sm:$0xff] }
   0x2   :  { %v107_v3 = vpack.c.bf16 %v76_v1, %v75_v0  ;;  %v78_v4 = vld [vmem:[%s4445_s1 + $0x18] sm:$0xff]  ;;  %v79_v6 = vld [vmem:[%s4445_s1 + $0x20] sm:$0xff]  ;;  %v80_v7 = vld [vmem:[%s4445_s1 + $0x28] sm:$0xff] }
   0x3   :  { %v108_v5 = vpack.c.bf16 %v78_v4, %v77_v2  ;;  %v81_v8 = vld [vmem:[%s4445_s1 + $0x30] sm:$0xff]  ;;  %v109_v9 = vpack.c.bf16 %v80_v7, %v79_v6  ;;  %v82_v10 = vld [vmem:[%s4445_s1 + $0x38] sm:$0xff]  ;;  %v3219_v11 = vld [vmem:[%s4444_s0] sm:$0xff]  }
   0x4   :  { %2720 = vmatprep.subr.bf16.mxu1 %v107_v3  ;;  %2736 = vmatprep.mubr.bf16.mxu1 %v3219_v11  ;;  %v110_v12 = vpack.c.bf16 %v82_v10, %v81_v8  ;;  %v83_v13 = vld [vmem:[%s4445_s1 + $0x40] sm:$0xff]  ;;  %v84_v14 = vld [vmem:[%s4445_s1 + $0x48] sm:$0xff]  ;;  %v85_v16 = vld [vmem:[%s4445_s1 + $0x50] sm:$0xff] }
   0x5   :  { %2721 = vmatpush3.bf16.msra.mxu1 %v107_v3  ;;  %v111_v15 = vpack.c.bf16 %v84_v14, %v83_v13  ;;  %v86_v17 = vld [vmem:[%s4445_s1 + $0x58] sm:$0xff]  ;;  %v87_v19 = vld [vmem:[%s4445_s1 + $0x60] sm:$0xff]  ;;  %v88_v20 = vld [vmem:[%s4445_s1 + $0x68] sm:$0xff] }
   0x6   :  { %2722 = vmatprep.subr.bf16.mxu1 %v108_v5  ;;  %v112_v18 = vpack.c.bf16 %v86_v17, %v85_v16  ;;  %v113_v21 = vpack.c.bf16 %v88_v20, %v87_v19  ;;  %v89_v22 = vld [vmem:[%s4445_s1 + $0x70] sm:$0xff]  ;;  %v90_v23 = vld [vmem:[%s4445_s1 + $0x78] sm:$0xff]  ;;  %v91_v25 = vld [vmem:[%s4445_s1 + $0x80] sm:$0xff] }
   0x7   :  { %v114_v24 = vpack.c.bf16 %v90_v23, %v89_v22  ;;  %v92_v26 = vld [vmem:[%s4445_s1 + $0x88] sm:$0xff]  ;;  %v93_v27 = vld [vmem:[%s4445_s1 + $0x90] sm:$0xff]  ;;  %v94_v28 = vld [vmem:[%s4445_s1 + $0x98] sm:$0xff] }
   0x8   :  { %v3261_v29 = vld [vmem:[%s4444_s0 + $0x8] sm:$0xff]   ;;  %v115_v30 = vpack.c.bf16 %v92_v26, %v91_v25  ;;  %v3266_v31 = vld [vmem:[%s4444_s0 + $0x10] sm:$0xff]   ;;  %v95_v32 = vld [vmem:[%s4445_s1 + $0xa0] sm:$0xff]  ;;  %v116_v34 = vpack.c.bf16 %v94_v28, %v93_v27 }
   0x9   :  { %2723 = vmatpush3.bf16.msra.mxu1 %v108_v5  ;;  %v96_v33 = vld [vmem:[%s4445_s1 + $0xa8] sm:$0xff]  ;;  %v97_v36 = vld [vmem:[%s4445_s1 + $0xb0] sm:$0xff]  ;;  %v98_v37 = vld [vmem:[%s4445_s1 + $0xb8] sm:$0xff] }
   0xa   :  { %2724 = vmatprep.subr.bf16.mxu1 %v109_v9  ;;  %v117_v35 = vpack.c.bf16 %v96_v33, %v95_v32 }
   0xd   :  { %2725 = vmatpush3.bf16.msra.mxu1 %v109_v9 }
   0xe   :  { %2726 = vmatprep.subr.bf16.mxu1 %v110_v12 }
  0x11   :  { %2727 = vmatpush3.bf16.msra.mxu1 %v110_v12 }
  0x12   :  { %2728 = vmatprep.subr.bf16.mxu1 %v111_v15 }
  0x15   :  { %2729 = vmatpush3.bf16.msra.mxu1 %v111_v15 }
  0x16   :  { %2730 = vmatprep.subr.bf16.mxu1 %v112_v18 }
  0x19   :  { %2731 = vmatpush3.bf16.msra.mxu1 %v112_v18 }
  0x1a   :  { %2732 = vmatprep.subr.bf16.mxu1 %v113_v21 }
  0x1d   :  { %2733 = vmatpush3.bf16.msra.mxu1 %v113_v21 }
  0x1e   :  { %2734 = vmatprep.subr.bf16.mxu1 %v114_v24 }
  0x21   :  { %2735 = vmatpush3.bf16.msra.mxu1 %v114_v24 }
  0x22   :  { %2752 = vmatprep.subr.bf16.mxu1 %v115_v30 }
  0x24   :  { %2737 = vmatmul.mubr.bf16.vlgmr.msra.gmra.mrb[0].mxu1 %v3261_v29 }
  0x25   :  { %2753 = vmatpush3.bf16.msra.mxu1 %v115_v30  ;;  %2740 = vmatprep.mubr.bf16.mxu1 %v3266_v31 }
  0x26   :  { %2754 = vmatprep.subr.bf16.mxu1 %v116_v34 }
  0x27   :  { %17 = vsyncpa [#allocation3], 0  ;;  %v3285_v38 = vld [vmem:[%s4444_s0 + $0x18] sm:$0xff]   ;;  %v3290_v39 = vld [vmem:[%s4444_s0 + $0x20] sm:$0xff]   ;;  %v118_v40 = vpack.c.bf16 %v98_v37, %v97_v36  ;;  %vm437_vm0 = vcmask 130048   ;;  %vm2492_vm1 = vcmask 1041409  }
  0x28   :  { %v99_v41 = vld [vmem:[%s4445_s1 + $0xc0] sm:$0xff]  ;;  %v100_v42 = vld [vmem:[%s4445_s1 + $0xc8] sm:$0xff]  ;;  %v101_v44 = vld [vmem:[%s4445_s1 + $0xd0] sm:$0xff] }
  0x29   :  { %2755 = vmatpush3.bf16.msra.mxu1 %v116_v34  ;;  %v119_v43 = vpack.c.bf16 %v100_v42, %v99_v41  ;;  %v102_v45 = vld [vmem:[%s4445_s1 + $0xd8] sm:$0xff]  ;;  %v3309_v46 = vld [vmem:[%s4444_s0 + $0x28] sm:$0xff]   ;;  %v3314_v47 = vld [vmem:[%s4444_s0 + $0x30] sm:$0xff]  }
  0x2a   :  { %2756 = vmatprep.subr.bf16.mxu1 %v117_v35  ;;  %v120_v48 = vpack.c.bf16 %v102_v45, %v101_v44  ;;  %v103_v49 = vld [vmem:[%s4445_s1 + $0xe0] sm:$0xff]  ;;  %v104_v50 = vld [vmem:[%s4445_s1 + $0xe8] sm:$0xff]  ;;  %v105_v52 = vld [vmem:[%s4445_s1 + $0xf0] sm:$0xff] }
  0x2b   :  { %v121_v51 = vpack.c.bf16 %v104_v50, %v103_v49  ;;  %v106_v53 = vld [vmem:[%s4445_s1 + $0xf8] sm:$0xff]  ;;  %v3338_v55 = vld [vmem:[%s4444_s0 + $0x40] sm:$0xff]   ;;  %v3345_v57 = vld [vmem:[%s4444_s0 + $0x48] sm:$0xff]  }
  0x2c   :  { %2741 = vmatmul.mubr.bf16.gmra.mrb[4].mxu1 %v3285_v38  ;;  %v3333_v54 = vld [vmem:[%s4444_s0 + $0x38] sm:$0xff]   ;;  %v122_v56 = vpack.c.bf16 %v106_v53, %v105_v52  ;;  %v3350_v58 = vld [vmem:[%s4444_s0 + $0x50] sm:$0xff]   ;;  %v3362_v60 = vld [vmem:[%s4444_s0 + $0x60] sm:$0xff]  }
  0x2d   :  { %2757 = vmatpush3.bf16.msra.mxu1 %v117_v35  ;;  %2744 = vmatprep.mubr.bf16.mxu1 %v3290_v39  ;;  %v3357_v59 = vld [vmem:[%s4444_s0 + $0x58] sm:$0xff]   ;;  %4463 = vst [vmem:[#allocation6_spill] sm:$0xff] %v3362_v60  ;;  %v3369_v61 = vld [vmem:[%s4444_s0 + $0x68] sm:$0xff]   ;;  %v3374_v62 = vld [vmem:[%s4444_s0 + $0x70] sm:$0xff]  }
  0x2e   :  { %2758 = vmatprep.subr.bf16.mxu1 %v118_v40  ;;  %4462 = vst [vmem:[#allocation5_spill] sm:$0xff] %v3357_v59  ;;  %4464 = vst [vmem:[#allocation7_spill] sm:$0xff] %v3369_v61  ;;  %v3381_v63 = vld [vmem:[%s4444_s0 + $0x78] sm:$0xff]   ;;  %v3062_v0 = vld [vmem:[%s4446_s2] sm:$0xff]  }
  0x2f   :  { %4465 = vst [vmem:[#allocation8_spill] sm:$0xff] %v3374_v62  ;;  %4466 = vst [vmem:[#allocation9_spill] sm:$0xff] %v3381_v63  ;;  %2784 = vmatprep.subr.bf16.mxu0 %v3062_v0 }
  0x30   :  { %2785 = vmatpush3.bf16.msra.mxu0 %v3062_v0 }
  0x31   :  { %2759 = vmatpush3.bf16.msra.mxu1 %v118_v40 }
  0x32   :  { %2760 = vmatprep.subr.bf16.mxu1 %v119_v43 }
  0x34   :  { %2745 = vmatmul.mubr.bf16.gmra.mrb[8].mxu1 %v3309_v46 }
  0x35   :  { %2761 = vmatpush3.bf16.msra.mxu1 %v119_v43  ;;  %2748 = vmatprep.mubr.bf16.mxu1 %v3314_v47 }
  0x36   :  { %2762 = vmatprep.subr.bf16.mxu1 %v120_v48 }
  0x39   :  { %2763 = vmatpush3.bf16.msra.mxu1 %v120_v48 }
  0x3a   :  { %2764 = vmatprep.subr.bf16.mxu1 %v121_v51 }
  0x3c   :  { %2749 = vmatmul.mubr.bf16.gmra.mrb[12].mxu1 %v3333_v54 }
  0x3d   :  { %2765 = vmatpush3.bf16.msra.mxu1 %v121_v51  ;;  %2768 = vmatprep.mubr.bf16.mxu1 %v3338_v55 }
  0x3e   :  { %2766 = vmatprep.subr.bf16.mxu1 %v122_v56 }
  0x41   :  { %2767 = vmatpush3.bf16.msra.mxu1 %v122_v56 }
  0x44   :  { %2769 = vmatmul.mubr.bf16.vlgmr.msra.gmra.mrb[16].mxu1 %v3345_v57 }
  0x45   :  { %2772 = vmatprep.mubr.bf16.mxu1 %v3350_v58 }
  0x4c   :  { %2773 = vmatmul.mubr.bf16.gmra.mrb[20].mxu1 %v3357_v59 }
  0x4d   :  { %2776 = vmatprep.mubr.bf16.mxu1 %v3362_v60 }
  0x54   :  { %2777 = vmatmul.mubr.bf16.gmra.mrb[24].mxu1 %v3369_v61 }
  0x55   :  { %2780 = vmatprep.mubr.bf16.mxu1 %v3374_v62 }
  0x5c   :  { %2781 = vmatmul.mubr.bf16.gmra.mrb[28].mxu1 %v3381_v63 }
  0x5d   :  { %2834 = vmatprep.mubr.bf16.mxu1 %v3219_v11 }
  0xf7   :  { %v2738_v1 = vpop.f32.mrb[0].mxu1 }
  0xf8   :  { %v205_v2 = vpop.f32.mrb[1].mxu1 }
  0xf9   :  { %v2739_v3 = vpop.f32.mrb[2].mxu1 }
  0xfa   :  { %v414_v4 = vpack.c.bf16 %v2739_v3, %v2738_v1  ;;  %v208_v5 = vpop.f32.mrb[3].mxu1 }
  0xfb   :  { %v413_v6 = vpack.c.bf16 %v208_v5, %v205_v2 }
  0xfd   :  { %2786 = vmatprep.mubr.msk.bf16.mxu0 %vm437_vm0, %v413_v6 }
  0xfe   :  { %2787 = vmatmul.mubr.msk.bf16.vlgmr.msra.gmra.mrb[0].mxu0 %vm437_vm0, %v414_v4 }
  0xff   :  { %v2742_v7 = vpop.f32.mrb[4].mxu1 }
 0x100   :  { %v221_v8 = vpop.f32.mrb[5].mxu1 }
 0x101   :  { %v2743_v9 = vpop.f32.mrb[6].mxu1 }
 0x102   :  { %v416_v10 = vpack.c.bf16 %v2743_v9, %v2742_v7  ;;  %v224_v11 = vpop.f32.mrb[7].mxu1 }
 0x103   :  { %v415_v12 = vpack.c.bf16 %v224_v11, %v221_v8 }
 0x105   :  { %2790 = vmatprep.mubr.msk.bf16.mxu0 %vm437_vm0, %v415_v12 }
 0x106   :  { %2791 = vmatmul.mubr.msk.bf16.gmra.mrb[4].mxu0 %vm437_vm0, %v416_v10 }
 0x107   :  { %v2746_v13 = vpop.f32.mrb[8].mxu1 }
 0x108   :  { %v237_v14 = vpop.f32.mrb[9].mxu1 }
 0x109   :  { %v2747_v15 = vpop.f32.mrb[10].mxu1 }
 0x10a   :  { %v418_v16 = vpack.c.bf16 %v2747_v15, %v2746_v13  ;;  %v240_v17 = vpop.f32.mrb[11].mxu1 }
 0x10b   :  { %v417_v18 = vpack.c.bf16 %v240_v17, %v237_v14 }
 0x10d   :  { %2794 = vmatprep.mubr.msk.bf16.mxu0 %vm437_vm0, %v417_v18 }
 0x10e   :  { %2795 = vmatmul.mubr.msk.bf16.gmra.mrb[8].mxu0 %vm437_vm0, %v418_v16 }
 0x10f   :  { %v2750_v19 = vpop.f32.mrb[12].mxu1 }
 0x110   :  { %v253_v20 = vpop.f32.mrb[13].mxu1 }
 0x111   :  { %v2751_v21 = vpop.f32.mrb[14].mxu1 }
 0x112   :  { %v420_v22 = vpack.c.bf16 %v2751_v21, %v2750_v19  ;;  %v256_v23 = vpop.f32.mrb[15].mxu1 }
 0x113   :  { %v419_v24 = vpack.c.bf16 %v256_v23, %v253_v20 }
 0x115   :  { %2798 = vmatprep.mubr.msk.bf16.mxu0 %vm437_vm0, %v419_v24 }
 0x116   :  { %2799 = vmatmul.mubr.msk.bf16.gmra.mrb[12].mxu0 %vm437_vm0, %v420_v22 }
 0x117   :  { %v2770_v25 = vpop.f32.mrb[16].mxu1 }
 0x118   :  { %v350_v26 = vpop.f32.mrb[17].mxu1 }
 0x119   :  { %v2771_v27 = vpop.f32.mrb[18].mxu1 }
 0x11a   :  { %v422_v28 = vpack.c.bf16 %v2771_v27, %v2770_v25  ;;  %v353_v30 = vpop.f32.mrb[19].mxu1 }
 0x11b   :  { %v421_v32 = vpack.c.bf16 %v353_v30, %v350_v26 }
 0x11d   :  { %2802 = vmatprep.mubr.msk.bf16.mxu0 %vm437_vm0, %v421_v32 }
 0x11e   :  { %2803 = vmatmul.mubr.msk.bf16.gmra.mrb[16].mxu0 %vm437_vm0, %v422_v28 }
 0x11f   :  { %v2774_v33 = vpop.f32.mrb[20].mxu1 }
 0x120   :  { %v366_v34 = vpop.f32.mrb[21].mxu1 }
 0x121   :  { %v2775_v35 = vpop.f32.mrb[22].mxu1 }
 0x122   :  { %v424_v36 = vpack.c.bf16 %v2775_v35, %v2774_v33  ;;  %v369_v37 = vpop.f32.mrb[23].mxu1 }
 0x123   :  { %v423_v40 = vpack.c.bf16 %v369_v37, %v366_v34 }
 0x125   :  { %2806 = vmatprep.mubr.msk.bf16.mxu0 %vm437_vm0, %v423_v40 }
 0x126   :  { %2807 = vmatmul.mubr.msk.bf16.gmra.mrb[20].mxu0 %vm437_vm0, %v424_v36 }
 0x127   :  { %v2778_v41 = vpop.f32.mrb[24].mxu1 }
 0x128   :  { %v382_v42 = vpop.f32.mrb[25].mxu1 }
 0x129   :  { %v2779_v43 = vpop.f32.mrb[26].mxu1 }
 0x12a   :  { %v426_v44 = vpack.c.bf16 %v2779_v43, %v2778_v41  ;;  %v385_v45 = vpop.f32.mrb[27].mxu1 }
 0x12b   :  { %v425_v48 = vpack.c.bf16 %v385_v45, %v382_v42 }
 0x12d   :  { %2810 = vmatprep.mubr.msk.bf16.mxu0 %vm437_vm0, %v425_v48 }
 0x12e   :  { %2811 = vmatmul.mubr.msk.bf16.gmra.mrb[24].mxu0 %vm437_vm0, %v426_v44 }
 0x12f   :  { %v2782_v49 = vpop.f32.mrb[28].mxu1 }
 0x130   :  { %v398_v50 = vpop.f32.mrb[29].mxu1 }
 0x131   :  { %v2783_v51 = vpop.f32.mrb[30].mxu1 }
 0x132   :  { %v428_v52 = vpack.c.bf16 %v2783_v51, %v2782_v49  ;;  %v401_v53 = vpop.f32.mrb[31].mxu1 }
 0x133   :  { %v427_v56 = vpack.c.bf16 %v401_v53, %v398_v50 }
 0x135   :  { %2814 = vmatprep.mubr.msk.bf16.mxu0 %vm437_vm0, %v427_v56 }
 0x136   :  { %2815 = vmatmul.mubr.msk.bf16.gmra.mrb[28].mxu0 %vm437_vm0, %v428_v52 }
 0x1d1   :  { %v3404_v0 = vpop.f32.mrb[0].mxu0 }
 0x1d2   :  { %v3406_v1 = vpop.f32.mrb[1].mxu0  ;;  %v686_v7 = vmul.f32 %v3404_v0, %v3404_v0 }
 0x1d3   :  { %v3408_v2 = vpop.f32.mrb[2].mxu0  ;;  %v684_v4 = vmul.f32 %v3406_v1, %v3406_v1 }
 0x1d4   :  { %v3410_v3 = vpop.f32.mrb[3].mxu0  ;;  %v687_v10 = vmul.f32 %v3408_v2, %v3408_v2 }
 0x1d5   :  { %v647_v5 = vadd.f32 %v3410_v3, %v3406_v1  ;;  %v685_v6 = vmul.f32 %v3410_v3, %v3410_v3 }
 0x1d7   :  { %v648_v8 = vadd.f32 %v3404_v0, %v647_v5  ;;  %v716_v9 = vadd.f32 %v685_v6, %v684_v4 }
 0x1d9   :  { %v717_v11 = vadd.f32 %v716_v9, %v686_v7  ;;  %v3423_v12 = vpop.f32.mrb[4].mxu0  ;;  %v649_v13 = vadd.f32 %v3408_v2, %v648_v8 }
 0x1da   :  { %v3426_v14 = vpop.f32.mrb[5].mxu0  ;;  %v690_v23 = vmul.f32 %v3423_v12, %v3423_v12 }
 0x1db   :  { %v650_v15 = vadd.f32 %v649_v13, %v3426_v14  ;;  %v688_v16 = vmul.f32 %v3426_v14, %v3426_v14  ;;  %v718_v17 = vadd.f32 %v717_v11, %v687_v10  ;;  %v3431_v18 = vpop.f32.mrb[6].mxu0 }
 0x1dc   :  { %v3433_v19 = vpop.f32.mrb[7].mxu0  ;;  %v691_v26 = vmul.f32 %v3431_v18, %v3431_v18 }
 0x1dd   :  { %v719_v20 = vadd.f32 %v718_v17, %v688_v16  ;;  %v651_v21 = vadd.f32 %v650_v15, %v3433_v19  ;;  %v689_v22 = vmul.f32 %v3433_v19, %v3433_v19 }
 0x1df   :  { %v652_v24 = vadd.f32 %v3423_v12, %v651_v21  ;;  %v720_v25 = vadd.f32 %v719_v20, %v689_v22 }
 0x1e1   :  { %v721_v27 = vadd.f32 %v720_v25, %v690_v23  ;;  %v3443_v28 = vpop.f32.mrb[8].mxu0  ;;  %v653_v30 = vadd.f32 %v3431_v18, %v652_v24 }
 0x1e2   :  { %v3446_v32 = vpop.f32.mrb[9].mxu0  ;;  %v694_v43 = vmul.f32 %v3443_v28, %v3443_v28 }
 0x1e3   :  { %v654_v33 = vadd.f32 %v653_v30, %v3446_v32  ;;  %v692_v34 = vmul.f32 %v3446_v32, %v3446_v32  ;;  %v722_v35 = vadd.f32 %v721_v27, %v691_v26  ;;  %v3451_v36 = vpop.f32.mrb[10].mxu0 }
 0x1e4   :  { %v3453_v37 = vpop.f32.mrb[11].mxu0  ;;  %v695_v48 = vmul.f32 %v3451_v36, %v3451_v36 }
 0x1e5   :  { %v723_v40 = vadd.f32 %v722_v35, %v692_v34  ;;  %v655_v41 = vadd.f32 %v654_v33, %v3453_v37  ;;  %v693_v42 = vmul.f32 %v3453_v37, %v3453_v37 }
 0x1e7   :  { %v656_v44 = vadd.f32 %v3443_v28, %v655_v41  ;;  %v724_v45 = vadd.f32 %v723_v40, %v693_v42 }
 0x1e9   :  { %v725_v49 = vadd.f32 %v724_v45, %v694_v43  ;;  %v3463_v50 = vpop.f32.mrb[12].mxu0  ;;  %v657_v51 = vadd.f32 %v3451_v36, %v656_v44 }
 0x1ea   :  { %v3466_v52 = vpop.f32.mrb[13].mxu0  ;;  %v698_v10 = vmul.f32 %v3463_v50, %v3463_v50 }
 0x1eb   :  { %v658_v53 = vadd.f32 %v657_v51, %v3466_v52  ;;  %v696_v56 = vmul.f32 %v3466_v52, %v3466_v52  ;;  %v726_v4 = vadd.f32 %v725_v49, %v695_v48  ;;  %v3471_v5 = vpop.f32.mrb[14].mxu0 }
 0x1ec   :  { %v3473_v6 = vpop.f32.mrb[15].mxu0  ;;  %v699_v15 = vmul.f32 %v3471_v5, %v3471_v5 }
 0x1ed   :  { %v727_v7 = vadd.f32 %v726_v4, %v696_v56  ;;  %v659_v8 = vadd.f32 %v658_v53, %v3473_v6  ;;  %v697_v9 = vmul.f32 %v3473_v6, %v3473_v6 }
 0x1ef   :  { %v660_v11 = vadd.f32 %v3463_v50, %v659_v8  ;;  %v728_v13 = vadd.f32 %v727_v7, %v697_v9 }
 0x1f1   :  { %v729_v16 = vadd.f32 %v728_v13, %v698_v10  ;;  %v3483_v17 = vpop.f32.mrb[16].mxu0  ;;  %v661_v20 = vadd.f32 %v3471_v5, %v660_v11 }
 0x1f2   :  { %v3486_v21 = vpop.f32.mrb[17].mxu0  ;;  %v702_v34 = vmul.f32 %v3483_v17, %v3483_v17 }
 0x1f3   :  { %v662_v22 = vadd.f32 %v661_v20, %v3486_v21  ;;  %v700_v23 = vmul.f32 %v3486_v21, %v3486_v21  ;;  %v730_v24 = vadd.f32 %v729_v16, %v699_v15  ;;  %v3491_v25 = vpop.f32.mrb[18].mxu0 }
 0x1f4   :  { %v3493_v26 = vpop.f32.mrb[19].mxu0  ;;  %v703_v41 = vmul.f32 %v3491_v25, %v3491_v25 }
 0x1f5   :  { %v731_v27 = vadd.f32 %v730_v24, %v700_v23  ;;  %v663_v30 = vadd.f32 %v662_v22, %v3493_v26  ;;  %v701_v33 = vmul.f32 %v3493_v26, %v3493_v26 }
 0x1f7   :  { %v664_v35 = vadd.f32 %v3483_v17, %v663_v30  ;;  %v732_v40 = vadd.f32 %v731_v27, %v701_v33 }
 0x1f9   :  { %v733_v42 = vadd.f32 %v732_v40, %v702_v34  ;;  %v3503_v43 = vpop.f32.mrb[20].mxu0  ;;  %v665_v44 = vadd.f32 %v3491_v25, %v664_v35 }
 0x1fa   :  { %v3506_v45 = vpop.f32.mrb[21].mxu0  ;;  %v706_v9 = vmul.f32 %v3503_v43, %v3503_v43 }
 0x1fb   :  { %v666_v48 = vadd.f32 %v665_v44, %v3506_v45  ;;  %v704_v49 = vmul.f32 %v3506_v45, %v3506_v45  ;;  %v734_v51 = vadd.f32 %v733_v42, %v703_v41  ;;  %v3511_v53 = vpop.f32.mrb[22].mxu0 }
 0x1fc   :  { %v3513_v56 = vpop.f32.mrb[23].mxu0  ;;  %v707_v13 = vmul.f32 %v3511_v53, %v3511_v53 }
 0x1fd   :  { %v735_v4 = vadd.f32 %v734_v51, %v704_v49  ;;  %v667_v7 = vadd.f32 %v666_v48, %v3513_v56  ;;  %v705_v8 = vmul.f32 %v3513_v56, %v3513_v56 }
 0x1ff   :  { %v668_v10 = vadd.f32 %v3503_v43, %v667_v7  ;;  %v736_v11 = vadd.f32 %v735_v4, %v705_v8 }
 0x201   :  { %v737_v15 = vadd.f32 %v736_v11, %v706_v9  ;;  %v3523_v16 = vpop.f32.mrb[24].mxu0  ;;  %v669_v20 = vadd.f32 %v3511_v53, %v668_v10 }
 0x202   :  { %v3526_v22 = vpop.f32.mrb[25].mxu0  ;;  %v710_v41 = vmul.f32 %v3523_v16, %v3523_v16 }
 0x203   :  { %v670_v23 = vadd.f32 %v669_v20, %v3526_v22  ;;  %v708_v24 = vmul.f32 %v3526_v22, %v3526_v22  ;;  %v738_v27 = vadd.f32 %v737_v15, %v707_v13  ;;  %v3531_v30 = vpop.f32.mrb[26].mxu0 }
 0x204   :  { %v3533_v33 = vpop.f32.mrb[27].mxu0  ;;  %v711_v48 = vmul.f32 %v3531_v30, %v3531_v30 }
 0x205   :  { %v739_v34 = vadd.f32 %v738_v27, %v708_v24  ;;  %v671_v35 = vadd.f32 %v670_v23, %v3533_v33  ;;  %v709_v40 = vmul.f32 %v3533_v33, %v3533_v33 }
 0x207   :  { %v672_v42 = vadd.f32 %v3523_v16, %v671_v35  ;;  %v740_v44 = vadd.f32 %v739_v34, %v709_v40 }
 0x209   :  { %v741_v49 = vadd.f32 %v740_v44, %v710_v41  ;;  %v3543_v51 = vpop.f32.mrb[28].mxu0  ;;  %v673_v4 = vadd.f32 %v3531_v30, %v672_v42 }
 0x20a   :  { %v3546_v7 = vpop.f32.mrb[29].mxu0  ;;  %v714_v24 = vmul.f32 %v3543_v51, %v3543_v51 }
 0x20b   :  { %v674_v8 = vadd.f32 %v673_v4, %v3546_v7  ;;  %v712_v9 = vmul.f32 %v3546_v7, %v3546_v7  ;;  %v742_v10 = vadd.f32 %v741_v49, %v711_v48  ;;  %v3551_v11 = vpop.f32.mrb[30].mxu0 }
 0x20c   :  { %v635_v13 = vpop.f32.mrb[31].mxu0  ;;  %v715_v35 = vmul.f32 %v3551_v11, %v3551_v11 }
 0x20d   :  { %v743_v15 = vadd.f32 %v742_v10, %v712_v9  ;;  %v675_v20 = vadd.f32 %v674_v8, %v635_v13  ;;  %v713_v23 = vmul.f32 %v635_v13, %v635_v13 }
 0x20f   :  { %v676_v27 = vadd.f32 %v3543_v51, %v675_v20  ;;  %v744_v34 = vadd.f32 %v743_v15, %v713_v23 }
 0x211   :  { %v677_v40 = vadd.f32 %v3551_v11, %v676_v27  ;;  %v745_v41 = vadd.f32 %v744_v34, %v714_v24  ;;  %v3063_v24 = vld [vmem:[%s4449_s5] sm:$0xff]   ;;  %v3064_v27 = vld [vmem:[%s4449_s5 + $0x8] sm:$0xff]  }
 0x212   :  { %2882 = vmatprep.subr.bf16.mxu0 %v3063_v24 }
 0x213   :  { %v678_v42 = vrot.slane %v677_v40, 4  ;;  %v746_v44 = vadd.f32 %v745_v41, %v715_v35  ;;  %2883 = vmatpush3.bf16.msra.mxu0 %v3063_v24  ;;  %v3069_v24 = vld [vmem:[%s4449_s5 + $0x30] sm:$0xff]  }
 0x214   :  { %2884 = vmatprep.subr.bf16.mxu0 %v3064_v27 }
 0x215   :  { %v679_v48 = vadd.f32 %v678_v42, %v677_v40  ;;  %v747_v49 = vrot.slane %v746_v44, 4  ;;  %v757_v40 = vld [vmem:[%s4447_s3] sm:$0x1] }
 0x217   :  { %v680_v4 = vrot.slane %v679_v48, 2  ;;  %v748_v9 = vadd.f32 %v747_v49, %v746_v44  ;;  %2885 = vmatpush3.bf16.msra.mxu0 %v3064_v27  ;;  %v761_v49 = vld [vmem:[%s4448_s4] sm:$0x1] }
 0x219   :  { %v681_v8 = vadd.f32 %v680_v4, %v679_v48  ;;  %v749_v10 = vrot.slane %v748_v9, 2  ;;  %v3068_v48 = vld [vmem:[%s4449_s5 + $0x28] sm:$0xff]  }
 0x21b   :  { %v682_v63 = vrot.slane %v681_v8, 1  ;;  %v750_v62 = vadd.f32 %v749_v10, %v748_v9 }
 0x21d   :  { %v683_v61 = vadd.f32 %v682_v63, %v681_v8  ;;  %v751_v60 = vrot.slane %v750_v62, 1 }
 0x21f   :  { %v752_v20 = vadd.f32 %v751_v60, %v750_v62  ;;  %v753_v15 = vmul.f32 0.0625, %v683_v61  ;;  %v3065_v60 = vld [vmem:[%s4449_s5 + $0x10] sm:$0xff]   ;;  %v765_v61 = vlaneseq  ;;  %v3066_v62 = vld [vmem:[%s4449_s5 + $0x18] sm:$0xff]  }
 0x220   :  { %2886 = vmatprep.subr.bf16.mxu0 %v3065_v60 }
 0x221   :  { %v754_v23 = vmul.f32 0.0625, %v752_v20  ;;  %v755_v59 = vmul.f32 %v753_v15, %v753_v15  ;;  %v766_v63 = vshrl.u32 %v765_v61, 7  ;;  %2887 = vmatpush3.bf16.msra.mxu0 %v3065_v60 }
 0x222   :  { %2888 = vmatprep.subr.bf16.mxu0 %v3066_v62 }
 0x223   :  { %v756_v34 = vsub.f32 %v754_v23, %v755_v59  ;;  %v3067_v59 = vld [vmem:[%s4449_s5 + $0x20] sm:$0xff]   ;;  %v3577_v41 = vsub.s32 0, %v766_v63 }
 0x225   :  { %v758_v35 = vadd.f32 1e-05, %v756_v34  ;;  %2889 = vmatpush3.bf16.msra.mxu0 %v3066_v62 }
 0x226   :  { %2890 = vmatprep.subr.bf16.mxu0 %v3067_v59 }
 0x227   :  { %3079 = vrsqrt.f32 %v758_v35 }
 0x229   :  { %2891 = vmatpush3.bf16.msra.mxu0 %v3067_v59 }
 0x22a   :  { %2892 = vmatprep.subr.bf16.mxu0 %v3068_v48 }
 0x22d   :  { %2893 = vmatpush3.bf16.msra.mxu0 %v3068_v48 }
 0x22e   :  { %2894 = vmatprep.subr.bf16.mxu0 %v3069_v24 }
 0x231   :  { %v3080_v42 = vpop.eup %3079  ;;  %2895 = vmatpush3.bf16.msra.mxu0 %v3069_v24 }
 0x232   :  { %v760_v44 = vmul.f32 %v3080_v42, %v757_v40 }
 0x234   :  { %v762_v4 = vmul.f32 %v760_v44, %v753_v15  ;;  %v768_v9 = vrot.slane %v760_v44, %v3577_v41 }
 0x236   :  { %v763_v8 = vsub.f32 %v761_v49, %v762_v4  ;;  %v799_v10 = vmul.f32 %v768_v9, %v635_v13  ;;  %v770_v20 = vmul.f32 %v768_v9, %v3406_v1  ;;  %v771_v23 = vmul.f32 %v768_v9, %v3410_v3 }
 0x237   :  { %v772_v27 = vmul.f32 %v3404_v0, %v768_v9  ;;  %v773_v34 = vmul.f32 %v3408_v2, %v768_v9  ;;  %v774_v15 = vmul.f32 %v768_v9, %v3426_v14  ;;  %v775_v35 = vmul.f32 %v768_v9, %v3433_v19 }
 0x238   :  { %v3596_v60 = vrot.slane %v763_v8, %v3577_v41  ;;  %v776_v1 = vmul.f32 %v3423_v12, %v768_v9  ;;  %v777_v3 = vmul.f32 %v3431_v18, %v768_v9  ;;  %v778_v13 = vmul.f32 %v768_v9, %v3446_v32  ;;  %v3070_v32 = vld [vmem:[%s4449_s5 + $0x38] sm:$0xff]  }
 0x239   :  { %v779_v61 = vmul.f32 %v768_v9, %v3453_v37  ;;  %v780_v62 = vmul.f32 %v3443_v28, %v768_v9  ;;  %v781_v0 = vmul.f32 %v3451_v36, %v768_v9  ;;  %v782_v2 = vmul.f32 %v768_v9, %v3466_v52  ;;  %2896 = vmatprep.subr.bf16.mxu0 %v3070_v32 }
 0x23a   :  { %v3606_v14 = vadd.f32 %v3596_v60, %v799_v10  ;;  %v783_v19 = vmul.f32 %v768_v9, %v3473_v6  ;;  %v784_v12 = vmul.f32 %v3463_v50, %v768_v9  ;;  %v785_v18 = vmul.f32 %v3471_v5, %v768_v9  ;;  %2897 = vmatpush3.bf16.msra.mxu0 %v3070_v32 }
 0x23b   :  { %v786_v28 = vmul.f32 %v768_v9, %v3486_v21  ;;  %v787_v36 = vmul.f32 %v768_v9, %v3493_v26  ;;  %v788_v37 = vmul.f32 %v3483_v17, %v768_v9  ;;  %v789_v52 = vmul.f32 %v3491_v25, %v768_v9 }
 0x23c   :  { %v790_v63 = vmul.f32 %v768_v9, %v3506_v45  ;;  %v791_v6 = vmul.f32 %v768_v9, %v3513_v56  ;;  %v792_v50 = vmul.f32 %v3503_v43, %v768_v9  ;;  %v793_v5 = vmul.f32 %v3511_v53, %v768_v9 }
 0x23d   :  { %v794_v59 = vmul.f32 %v768_v9, %v3526_v22  ;;  %v795_v40 = vmul.f32 %v768_v9, %v3533_v33  ;;  %v796_v21 = vmul.f32 %v3523_v16, %v768_v9  ;;  %v797_v26 = vmul.f32 %v3531_v30, %v768_v9 }
 0x23e   :  { %v798_v17 = vmul.f32 %v768_v9, %v3546_v7  ;;  %v800_v25 = vmul.f32 %v3543_v51, %v768_v9  ;;  %v801_v45 = vmul.f32 %v3551_v11, %v768_v9  ;;  %v808_v56 = vadd.f32 %v3596_v60, %v770_v20 }
 0x23f   :  { %v809_v43 = vadd.f32 %v3596_v60, %v771_v23  ;;  %v810_v53 = vadd.f32 %v3596_v60, %v772_v27  ;;  %v811_v22 = vadd.f32 %v3596_v60, %v773_v34  ;;  %v812_v16 = vadd.f32 %v3596_v60, %v774_v15 }
 0x240   :  { %v813_v30 = vadd.f32 %v3596_v60, %v775_v35  ;;  %v814_v33 = vadd.f32 %v3596_v60, %v776_v1  ;;  %v815_v7 = vadd.f32 %v3596_v60, %v777_v3  ;;  %v816_v51 = vadd.f32 %v3596_v60, %v778_v13 }
 0x241   :  { %v817_v11 = vadd.f32 %v3596_v60, %v779_v61  ;;  %v818_v42 = vadd.f32 %v3596_v60, %v780_v62  ;;  %v819_v44 = vadd.f32 %v3596_v60, %v781_v0  ;;  %v820_v48 = vadd.f32 %v3596_v60, %v782_v2 }
 0x242   :  { %v821_v49 = vadd.f32 %v3596_v60, %v783_v19  ;;  %v822_v4 = vadd.f32 %v3596_v60, %v784_v12  ;;  %v823_v9 = vadd.f32 %v3596_v60, %v785_v18  ;;  %v824_v8 = vadd.f32 %v3596_v60, %v786_v28 }
 0x243   :  { %v825_v10 = vadd.f32 %v3596_v60, %v787_v36  ;;  %v826_v20 = vadd.f32 %v3596_v60, %v788_v37  ;;  %v827_v23 = vadd.f32 %v3596_v60, %v789_v52  ;;  %v828_v24 = vadd.f32 %v3596_v60, %v790_v63 }
 0x244   :  { %v829_v27 = vadd.f32 %v3596_v60, %v791_v6  ;;  %v830_v34 = vadd.f32 %v3596_v60, %v792_v50  ;;  %v831_v15 = vadd.f32 %v3596_v60, %v793_v5  ;;  %v832_v35 = vadd.f32 %v3596_v60, %v794_v59 }
 0x245   :  { %v833_v1 = vadd.f32 %v3596_v60, %v795_v40  ;;  %v834_v3 = vadd.f32 %v3596_v60, %v796_v21  ;;  %v835_v13 = vadd.f32 %v3596_v60, %v797_v26  ;;  %v836_v61 = vadd.f32 %v3596_v60, %v798_v17 }
 0x246   :  { %v838_v62 = vadd.f32 %v3596_v60, %v800_v25  ;;  %v839_v0 = vadd.f32 %v3596_v60, %v801_v45  ;;  %v840_v2 = vmax.f32 %v808_v56, 0.0  ;;  %v841_v19 = vmax.f32 %v809_v43, 0.0 }
 0x247   :  { %v842_v12 = vmax.f32 %v810_v53, 0.0  ;;  %v843_v18 = vmax.f32 %v811_v22, 0.0  ;;  %v844_v32 = vmax.f32 %v812_v16, 0.0  ;;  %v845_v28 = vmax.f32 %v813_v30, 0.0 }
 0x248   :  { %v872_v36 = vpack.c.bf16 %v841_v19, %v840_v2  ;;  %v846_v37 = vmax.f32 %v814_v33, 0.0  ;;  %v847_v52 = vmax.f32 %v815_v7, 0.0  ;;  %v848_v63 = vmax.f32 %v816_v51, 0.0 }
 0x249   :  { %v873_v6 = vpack.c.bf16 %v843_v18, %v842_v12  ;;  %v874_v50 = vpack.c.bf16 %v845_v28, %v844_v32  ;;  %v849_v5 = vmax.f32 %v817_v11, 0.0  ;;  %v850_v59 = vmax.f32 %v818_v42, 0.0 }
 0x24a   :  { %2818 = vmatprep.subr.bf16.mxu1 %v872_v36  ;;  %v875_v40 = vpack.c.bf16 %v847_v52, %v846_v37  ;;  %v851_v21 = vmax.f32 %v819_v44, 0.0  ;;  %v852_v26 = vmax.f32 %v820_v48, 0.0  ;;  %v853_v17 = vmax.f32 %v821_v49, 0.0 }
 0x24b   :  { %2819 = vmatpush3.bf16.msra.mxu1 %v872_v36  ;;  %v876_v60 = vpack.c.bf16 %v849_v5, %v848_v63  ;;  %v854_v25 = vmax.f32 %v822_v4, 0.0  ;;  %v855_v45 = vmax.f32 %v823_v9, 0.0  ;;  %v856_v56 = vmax.f32 %v824_v8, 0.0 }
 0x24c   :  { %2820 = vmatprep.subr.bf16.mxu1 %v873_v6  ;;  %v877_v43 = vpack.c.bf16 %v851_v21, %v850_v59  ;;  %v878_v53 = vpack.c.bf16 %v853_v17, %v852_v26  ;;  %v857_v22 = vmax.f32 %v825_v10, 0.0  ;;  %v858_v16 = vmax.f32 %v826_v20, 0.0 }
 0x24d   :  { %v879_v30 = vpack.c.bf16 %v855_v45, %v854_v25  ;;  %v859_v33 = vmax.f32 %v827_v23, 0.0  ;;  %v860_v7 = vmax.f32 %v828_v24, 0.0  ;;  %v861_v51 = vmax.f32 %v829_v27, 0.0 }
 0x24e   :  { %v880_v11 = vpack.c.bf16 %v857_v22, %v856_v56  ;;  %v862_v42 = vmax.f32 %v830_v34, 0.0  ;;  %v863_v2 = vmax.f32 %v831_v15, 0.0  ;;  %v864_v44 = vmax.f32 %v832_v35, 0.0 }
 0x24f   :  { %2821 = vmatpush3.bf16.msra.mxu1 %v873_v6  ;;  %v881_v48 = vpack.c.bf16 %v859_v33, %v858_v16  ;;  %v882_v49 = vpack.c.bf16 %v861_v51, %v860_v7  ;;  %v865_v19 = vmax.f32 %v833_v1, 0.0  ;;  %v866_v4 = vmax.f32 %v834_v3, 0.0 }
 0x250   :  { %2822 = vmatprep.subr.bf16.mxu1 %v874_v50  ;;  %v883_v9 = vpack.c.bf16 %v863_v2, %v862_v42  ;;  %v867_v8 = vmax.f32 %v835_v13, 0.0  ;;  %v868_v12 = vmax.f32 %v836_v61, 0.0  ;;  %v869_v10 = vmax.f32 %v3606_v14, 0.0 }
 0x251   :  { %v884_v20 = vpack.c.bf16 %v865_v19, %v864_v44  ;;  %v870_v18 = vmax.f32 %v838_v62, 0.0  ;;  %v871_v23 = vmax.f32 %v839_v0, 0.0 }
 0x252   :  { %v885_v24 = vpack.c.bf16 %v867_v8, %v866_v4  ;;  %v886_v27 = vpack.c.bf16 %v869_v10, %v868_v12 }
 0x253   :  { %2823 = vmatpush3.bf16.msra.mxu1 %v874_v50  ;;  %v887_v34 = vpack.c.bf16 %v871_v23, %v870_v18 }
 0x254   :  { %2824 = vmatprep.subr.bf16.mxu1 %v875_v40 }
 0x257   :  { %2825 = vmatpush3.bf16.msra.mxu1 %v875_v40 }
 0x258   :  { %2826 = vmatprep.subr.bf16.mxu1 %v876_v60 }
 0x25b   :  { %2827 = vmatpush3.bf16.msra.mxu1 %v876_v60 }
 0x25c   :  { %2828 = vmatprep.subr.bf16.mxu1 %v877_v43 }
 0x25f   :  { %2829 = vmatpush3.bf16.msra.mxu1 %v877_v43 }
 0x260   :  { %2830 = vmatprep.subr.bf16.mxu1 %v878_v53 }
 0x263   :  { %2831 = vmatpush3.bf16.msra.mxu1 %v878_v53 }
 0x264   :  { %2832 = vmatprep.subr.bf16.mxu1 %v879_v30 }
 0x267   :  { %2833 = vmatpush3.bf16.msra.mxu1 %v879_v30 }
 0x268   :  { %2850 = vmatprep.subr.bf16.mxu1 %v880_v11 }
 0x26a   :  { %2835 = vmatmul.mubr.bf16.vlgmr.msra.gmra.mrb[32].mxu1 %v3261_v29  ;;  %v4467_v29 = vld [vmem:[#allocation5_spill] sm:$0xff] }
 0x26b   :  { %2851 = vmatpush3.bf16.msra.mxu1 %v880_v11  ;;  %2838 = vmatprep.mubr.bf16.mxu1 %v3266_v31  ;;  %v4468_v31 = vld [vmem:[#allocation6_spill] sm:$0xff] }
 0x26c   :  { %2852 = vmatprep.subr.bf16.mxu1 %v881_v48 }
 0x26f   :  { %2853 = vmatpush3.bf16.msra.mxu1 %v881_v48 }
 0x270   :  { %2854 = vmatprep.subr.bf16.mxu1 %v882_v49 }
 0x272   :  { %2839 = vmatmul.mubr.bf16.gmra.mrb[36].mxu1 %v3285_v38  ;;  %v4469_v38 = vld [vmem:[#allocation7_spill] sm:$0xff] }
 0x273   :  { %2855 = vmatpush3.bf16.msra.mxu1 %v882_v49  ;;  %2842 = vmatprep.mubr.bf16.mxu1 %v3290_v39  ;;  %v4470_v39 = vld [vmem:[#allocation8_spill] sm:$0xff] }
 0x274   :  { %2856 = vmatprep.subr.bf16.mxu1 %v883_v9 }
 0x277   :  { %2857 = vmatpush3.bf16.msra.mxu1 %v883_v9 }
 0x278   :  { %2858 = vmatprep.subr.bf16.mxu1 %v884_v20 }
 0x27a   :  { %2843 = vmatmul.mubr.bf16.gmra.mrb[40].mxu1 %v3309_v46  ;;  %v4471_v46 = vld [vmem:[#allocation9_spill] sm:$0xff] }
 0x27b   :  { %2859 = vmatpush3.bf16.msra.mxu1 %v884_v20  ;;  %2846 = vmatprep.mubr.bf16.mxu1 %v3314_v47  ;;  %v3085_v47 = vld [vmem:[%s4444_s0] sm:$0xff]  }
 0x27c   :  { %2860 = vmatprep.subr.bf16.mxu1 %v885_v24 }
 0x27f   :  { %2861 = vmatpush3.bf16.msra.mxu1 %v885_v24 }
 0x280   :  { %2862 = vmatprep.subr.bf16.mxu1 %v886_v27 }
 0x282   :  { %2847 = vmatmul.mubr.bf16.gmra.mrb[44].mxu1 %v3333_v54 }
 0x283   :  { %2863 = vmatpush3.bf16.msra.mxu1 %v886_v27  ;;  %2866 = vmatprep.mubr.bf16.mxu1 %v3338_v55 }
 0x284   :  { %2864 = vmatprep.subr.bf16.mxu1 %v887_v34 }
 0x287   :  { %2865 = vmatpush3.bf16.msra.mxu1 %v887_v34 }
 0x28a   :  { %2867 = vmatmul.mubr.bf16.vlgmr.msra.gmra.mrb[48].mxu1 %v3345_v57 }
 0x28b   :  { %2870 = vmatprep.mubr.bf16.mxu1 %v3350_v58 }
 0x292   :  { %2871 = vmatmul.mubr.bf16.gmra.mrb[52].mxu1 %v4467_v29 }
 0x293   :  { %2874 = vmatprep.mubr.bf16.mxu1 %v4468_v31 }
 0x29a   :  { %2875 = vmatmul.mubr.bf16.gmra.mrb[56].mxu1 %v4469_v38 }
 0x29b   :  { %2878 = vmatprep.mubr.bf16.mxu1 %v4470_v39 }
 0x2a2   :  { %2879 = vmatmul.mubr.bf16.gmra.mrb[60].mxu1 %v4471_v46 }
 0x2a3   :  { %2946 = vmatprep.mubr.bf16.mxu1 %v3085_v47 }
 0x33d   :  { %v2836_v54 = vpop.f32.mrb[32].mxu1 }
 0x33e   :  { %v922_v55 = vpop.f32.mrb[33].mxu1 }
 0x33f   :  { %v2837_v57 = vpop.f32.mrb[34].mxu1 }
 0x340   :  { %v1083_v14 = vpack.c.bf16 %v2837_v57, %v2836_v54  ;;  %v925_v58 = vpop.f32.mrb[35].mxu1 }
 0x341   :  { %v1082_v15 = vpack.c.bf16 %v925_v58, %v922_v55 }
 0x343   :  { %2898 = vmatprep.mubr.bf16.mxu0 %v1082_v15 }
 0x344   :  { %2899 = vmatmul.mubr.bf16.vlgmr.msra.gmra.mrb[32].mxu0 %v1083_v14 }
 0x345   :  { %v2840_v35 = vpop.f32.mrb[36].mxu1 }
 0x346   :  { %v938_v1 = vpop.f32.mrb[37].mxu1 }
 0x347   :  { %v2841_v3 = vpop.f32.mrb[38].mxu1 }
 0x348   :  { %v1085_v13 = vpack.c.bf16 %v2841_v3, %v2840_v35  ;;  %v941_v61 = vpop.f32.mrb[39].mxu1 }
 0x349   :  { %v1084_v62 = vpack.c.bf16 %v941_v61, %v938_v1 }
 0x34b   :  { %2902 = vmatprep.mubr.bf16.mxu0 %v1084_v62 }
 0x34c   :  { %2903 = vmatmul.mubr.bf16.gmra.mrb[36].mxu0 %v1085_v13 }
 0x34d   :  { %v2844_v0 = vpop.f32.mrb[40].mxu1 }
 0x34e   :  { %v954_v32 = vpop.f32.mrb[41].mxu1 }
 0x34f   :  { %v2845_v28 = vpop.f32.mrb[42].mxu1 }
 0x350   :  { %v1087_v36 = vpack.c.bf16 %v2845_v28, %v2844_v0  ;;  %v957_v37 = vpop.f32.mrb[43].mxu1 }
 0x351   :  { %v1086_v52 = vpack.c.bf16 %v957_v37, %v954_v32 }
 0x353   :  { %2906 = vmatprep.mubr.bf16.mxu0 %v1086_v52 }
 0x354   :  { %2907 = vmatmul.mubr.bf16.gmra.mrb[40].mxu0 %v1087_v36 }
 0x355   :  { %v2848_v63 = vpop.f32.mrb[44].mxu1 }
 0x356   :  { %v970_v6 = vpop.f32.mrb[45].mxu1 }
 0x357   :  { %v2849_v50 = vpop.f32.mrb[46].mxu1 }
 0x358   :  { %v1089_v5 = vpack.c.bf16 %v2849_v50, %v2848_v63  ;;  %v973_v59 = vpop.f32.mrb[47].mxu1 }
 0x359   :  { %v1088_v40 = vpack.c.bf16 %v973_v59, %v970_v6 }
 0x35b   :  { %2910 = vmatprep.mubr.bf16.mxu0 %v1088_v40 }
 0x35c   :  { %2911 = vmatmul.mubr.bf16.gmra.mrb[44].mxu0 %v1089_v5 }
 0x35d   :  { %v2868_v21 = vpop.f32.mrb[48].mxu1 }
 0x35e   :  { %v1019_v26 = vpop.f32.mrb[49].mxu1 }
 0x35f   :  { %v2869_v17 = vpop.f32.mrb[50].mxu1 }
 0x360   :  { %v1091_v60 = vpack.c.bf16 %v2869_v17, %v2868_v21  ;;  %v1022_v25 = vpop.f32.mrb[51].mxu1 }
 0x361   :  { %v1090_v45 = vpack.c.bf16 %v1022_v25, %v1019_v26 }
 0x363   :  { %2914 = vmatprep.mubr.bf16.mxu0 %v1090_v45 }
 0x364   :  { %2915 = vmatmul.mubr.bf16.gmra.mrb[48].mxu0 %v1091_v60 }
 0x365   :  { %v2872_v56 = vpop.f32.mrb[52].mxu1 }
 0x366   :  { %v1035_v43 = vpop.f32.mrb[53].mxu1 }
 0x367   :  { %v2873_v53 = vpop.f32.mrb[54].mxu1 }
 0x368   :  { %v1093_v22 = vpack.c.bf16 %v2873_v53, %v2872_v56  ;;  %v1038_v16 = vpop.f32.mrb[55].mxu1 }
 0x369   :  { %v1092_v30 = vpack.c.bf16 %v1038_v16, %v1035_v43 }
 0x36b   :  { %2918 = vmatprep.mubr.bf16.mxu0 %v1092_v30 }
 0x36c   :  { %2919 = vmatmul.mubr.bf16.gmra.mrb[52].mxu0 %v1093_v22 }
 0x36d   :  { %v2876_v33 = vpop.f32.mrb[56].mxu1 }
 0x36e   :  { %v1051_v7 = vpop.f32.mrb[57].mxu1 }
 0x36f   :  { %v2877_v51 = vpop.f32.mrb[58].mxu1 }
 0x370   :  { %v1095_v11 = vpack.c.bf16 %v2877_v51, %v2876_v33  ;;  %v1054_v42 = vpop.f32.mrb[59].mxu1 }
 0x371   :  { %v1094_v2 = vpack.c.bf16 %v1054_v42, %v1051_v7 }
 0x373   :  { %2922 = vmatprep.mubr.bf16.mxu0 %v1094_v2 }
 0x374   :  { %2923 = vmatmul.mubr.bf16.gmra.mrb[56].mxu0 %v1095_v11 }
 0x375   :  { %v2880_v44 = vpop.f32.mrb[60].mxu1 }
 0x376   :  { %v1067_v48 = vpop.f32.mrb[61].mxu1 }
 0x377   :  { %v2881_v49 = vpop.f32.mrb[62].mxu1 }
 0x378   :  { %v1097_v19 = vpack.c.bf16 %v2881_v49, %v2880_v44  ;;  %v1070_v4 = vpop.f32.mrb[63].mxu1 }
 0x379   :  { %v1096_v9 = vpack.c.bf16 %v1070_v4, %v1067_v48 }
 0x37b   :  { %2926 = vmatprep.mubr.bf16.mxu0 %v1096_v9 }
 0x37c   :  { %2927 = vmatmul.mubr.bf16.gmra.mrb[60].mxu0 %v1097_v19 }
 0x417   :  { %v3679_v8 = vpop.f32.mrb[32].mxu0 }
 0x418   :  { %v3681_v12 = vpop.f32.mrb[33].mxu0  ;;  %v1362_v27 = vmul.f32 %v3679_v8, %v3679_v8 }
 0x419   :  { %v3683_v10 = vpop.f32.mrb[34].mxu0  ;;  %v1360_v18 = vmul.f32 %v3681_v12, %v3681_v12 }
 0x41a   :  { %v3685_v20 = vpop.f32.mrb[35].mxu0  ;;  %v1363_v31 = vmul.f32 %v3683_v10, %v3683_v10 }
 0x41b   :  { %v1323_v23 = vadd.f32 %v3685_v20, %v3681_v12  ;;  %v1361_v24 = vmul.f32 %v3685_v20, %v3685_v20 }
 0x41d   :  { %v1324_v34 = vadd.f32 %v3679_v8, %v1323_v23  ;;  %v1392_v29 = vadd.f32 %v1361_v24, %v1360_v18 }
 0x41f   :  { %v1393_v38 = vadd.f32 %v1392_v29, %v1362_v27  ;;  %v3698_v39 = vpop.f32.mrb[36].mxu0  ;;  %v1325_v46 = vadd.f32 %v3683_v10, %v1324_v34 }
 0x420   :  { %v3701_v47 = vpop.f32.mrb[37].mxu0  ;;  %v1366_v3 = vmul.f32 %v3698_v39, %v3698_v39 }
 0x421   :  { %v1326_v54 = vadd.f32 %v1325_v46, %v3701_v47  ;;  %v1364_v55 = vmul.f32 %v3701_v47, %v3701_v47  ;;  %v1394_v57 = vadd.f32 %v1393_v38, %v1363_v31  ;;  %v3706_v14 = vpop.f32.mrb[38].mxu0 }
 0x422   :  { %v3708_v58 = vpop.f32.mrb[39].mxu0  ;;  %v1367_v62 = vmul.f32 %v3706_v14, %v3706_v14 }
 0x423   :  { %v1395_v15 = vadd.f32 %v1394_v57, %v1364_v55  ;;  %v1327_v35 = vadd.f32 %v1326_v54, %v3708_v58  ;;  %v1365_v1 = vmul.f32 %v3708_v58, %v3708_v58 }
 0x425   :  { %v1328_v13 = vadd.f32 %v3698_v39, %v1327_v35  ;;  %v1396_v61 = vadd.f32 %v1395_v15, %v1365_v1 }
 0x427   :  { %v1397_v0 = vadd.f32 %v1396_v61, %v1366_v3  ;;  %v3718_v32 = vpop.f32.mrb[40].mxu0  ;;  %v1329_v28 = vadd.f32 %v3706_v14, %v1328_v13 }
 0x428   :  { %v3721_v36 = vpop.f32.mrb[41].mxu0  ;;  %v1370_v21 = vmul.f32 %v3718_v32, %v3718_v32 }
 0x429   :  { %v1330_v37 = vadd.f32 %v1329_v28, %v3721_v36  ;;  %v1368_v52 = vmul.f32 %v3721_v36, %v3721_v36  ;;  %v1398_v63 = vadd.f32 %v1397_v0, %v1367_v62  ;;  %v3726_v6 = vpop.f32.mrb[42].mxu0 }
 0x42a   :  { %v3728_v50 = vpop.f32.mrb[43].mxu0  ;;  %v1371_v60 = vmul.f32 %v3726_v6, %v3726_v6 }
 0x42b   :  { %v1399_v5 = vadd.f32 %v1398_v63, %v1368_v52  ;;  %v1331_v59 = vadd.f32 %v1330_v37, %v3728_v50  ;;  %v1369_v40 = vmul.f32 %v3728_v50, %v3728_v50 }
 0x42d   :  { %v1332_v26 = vadd.f32 %v3718_v32, %v1331_v59  ;;  %v1400_v17 = vadd.f32 %v1399_v5, %v1369_v40 }
 0x42f   :  { %v1401_v25 = vadd.f32 %v1400_v17, %v1370_v21  ;;  %v3738_v45 = vpop.f32.mrb[44].mxu0  ;;  %v1333_v56 = vadd.f32 %v3726_v6, %v1332_v26 }
 0x430   :  { %v3741_v43 = vpop.f32.mrb[45].mxu0  ;;  %v1374_v42 = vmul.f32 %v3738_v45, %v3738_v45 }
 0x431   :  { %v1334_v53 = vadd.f32 %v1333_v56, %v3741_v43  ;;  %v1372_v22 = vmul.f32 %v3741_v43, %v3741_v43  ;;  %v1402_v16 = vadd.f32 %v1401_v25, %v1371_v60  ;;  %v3746_v30 = vpop.f32.mrb[46].mxu0 }
 0x432   :  { %v3748_v33 = vpop.f32.mrb[47].mxu0  ;;  %v1375_v48 = vmul.f32 %v3746_v30, %v3746_v30 }
 0x433   :  { %v1403_v7 = vadd.f32 %v1402_v16, %v1372_v22  ;;  %v1335_v51 = vadd.f32 %v1334_v53, %v3748_v33  ;;  %v1373_v11 = vmul.f32 %v3748_v33, %v3748_v33 }
 0x435   :  { %v1336_v2 = vadd.f32 %v3738_v45, %v1335_v51  ;;  %v1404_v44 = vadd.f32 %v1403_v7, %v1373_v11 }
 0x437   :  { %v1405_v49 = vadd.f32 %v1404_v44, %v1374_v42  ;;  %v3758_v19 = vpop.f32.mrb[48].mxu0  ;;  %v1337_v4 = vadd.f32 %v3746_v30, %v1336_v2 }
 0x438   :  { %v3761_v9 = vpop.f32.mrb[49].mxu0  ;;  %v1378_v46 = vmul.f32 %v3758_v19, %v3758_v19 }
 0x439   :  { %v1338_v18 = vadd.f32 %v1337_v4, %v3761_v9  ;;  %v1376_v23 = vmul.f32 %v3761_v9, %v3761_v9  ;;  %v1406_v24 = vadd.f32 %v1405_v49, %v1375_v48  ;;  %v3766_v27 = vpop.f32.mrb[50].mxu0 }
 0x43a   :  { %v3768_v34 = vpop.f32.mrb[51].mxu0  ;;  %v1379_v57 = vmul.f32 %v3766_v27, %v3766_v27 }
 0x43b   :  { %v1407_v29 = vadd.f32 %v1406_v24, %v1376_v23  ;;  %v1339_v31 = vadd.f32 %v1338_v18, %v3768_v34  ;;  %v1377_v38 = vmul.f32 %v3768_v34, %v3768_v34 }
 0x43d   :  { %v1340_v54 = vadd.f32 %v3758_v19, %v1339_v31  ;;  %v1408_v55 = vadd.f32 %v1407_v29, %v1377_v38 }
 0x43f   :  { %v1409_v15 = vadd.f32 %v1408_v55, %v1378_v46  ;;  %v3778_v35 = vpop.f32.mrb[52].mxu0  ;;  %v1341_v1 = vadd.f32 %v3766_v27, %v1340_v54 }
 0x440   :  { %v3781_v3 = vpop.f32.mrb[53].mxu0  ;;  %v1382_v5 = vmul.f32 %v3778_v35, %v3778_v35 }
 0x441   :  { %v1342_v13 = vadd.f32 %v1341_v1, %v3781_v3  ;;  %v1380_v61 = vmul.f32 %v3781_v3, %v3781_v3  ;;  %v1410_v62 = vadd.f32 %v1409_v15, %v1379_v57  ;;  %v3786_v0 = vpop.f32.mrb[54].mxu0 }
 0x442   :  { %v3788_v28 = vpop.f32.mrb[55].mxu0  ;;  %v1383_v21 = vmul.f32 %v3786_v0, %v3786_v0 }
 0x443   :  { %v1411_v37 = vadd.f32 %v1410_v62, %v1380_v61  ;;  %v1343_v52 = vadd.f32 %v1342_v13, %v3788_v28  ;;  %v1381_v63 = vmul.f32 %v3788_v28, %v3788_v28 }
 0x445   :  { %v1344_v59 = vadd.f32 %v3778_v35, %v1343_v52  ;;  %v1412_v40 = vadd.f32 %v1411_v37, %v1381_v63 }
 0x447   :  { %v1413_v26 = vadd.f32 %v1412_v40, %v1382_v5  ;;  %v3798_v17 = vpop.f32.mrb[56].mxu0  ;;  %v1345_v60 = vadd.f32 %v3786_v0, %v1344_v59 }
 0x448   :  { %v3801_v25 = vpop.f32.mrb[57].mxu0  ;;  %v1386_v2 = vmul.f32 %v3798_v17, %v3798_v17 }
 0x449   :  { %v1346_v56 = vadd.f32 %v1345_v60, %v3801_v25  ;;  %v1384_v53 = vmul.f32 %v3801_v25, %v3801_v25  ;;  %v1414_v22 = vadd.f32 %v1413_v26, %v1383_v21  ;;  %v3806_v16 = vpop.f32.mrb[58].mxu0 }
 0x44a   :  { %v3808_v7 = vpop.f32.mrb[59].mxu0  ;;  %v1387_v49 = vmul.f32 %v3806_v16, %v3806_v16 }
 0x44b   :  { %v1415_v51 = vadd.f32 %v1414_v22, %v1384_v53  ;;  %v1347_v11 = vadd.f32 %v1346_v56, %v3808_v7  ;;  %v1385_v42 = vmul.f32 %v3808_v7, %v3808_v7 }
 0x44d   :  { %v1348_v44 = vadd.f32 %v3798_v17, %v1347_v11  ;;  %v1416_v48 = vadd.f32 %v1415_v51, %v1385_v42 }
 0x44f   :  { %v1417_v4 = vadd.f32 %v1416_v48, %v1386_v2  ;;  %v3818_v18 = vpop.f32.mrb[60].mxu0  ;;  %v1349_v23 = vadd.f32 %v3806_v16, %v1348_v44 }
 0x450   :  { %v3821_v24 = vpop.f32.mrb[61].mxu0  ;;  %v1390_v1 = vmul.f32 %v3818_v18, %v3818_v18 }
 0x451   :  { %v1350_v29 = vadd.f32 %v1349_v23, %v3821_v24  ;;  %v1388_v31 = vmul.f32 %v3821_v24, %v3821_v24  ;;  %v1418_v38 = vadd.f32 %v1417_v4, %v1387_v49  ;;  %v3826_v46 = vpop.f32.mrb[62].mxu0  ;;  %v3071_v49 = vld [vmem:[%s4452_s8] sm:$0xff]   ;;  %v3072_v4 = vld [vmem:[%s4452_s8 + $0x8] sm:$0xff]  }
 0x452   :  { %v1311_v54 = vpop.f32.mrb[63].mxu0  ;;  %v1391_v62 = vmul.f32 %v3826_v46, %v3826_v46  ;;  %2994 = vmatprep.subr.bf16.mxu0 %v3071_v49 }
 0x453   :  { %v1419_v55 = vadd.f32 %v1418_v38, %v1388_v31  ;;  %v1351_v57 = vadd.f32 %v1350_v29, %v1311_v54  ;;  %v1389_v15 = vmul.f32 %v1311_v54, %v1311_v54  ;;  %2995 = vmatpush3.bf16.msra.mxu0 %v3071_v49  ;;  %v3073_v31 = vld [vmem:[%s4452_s8 + $0x10] sm:$0xff]   ;;  %v3074_v38 = vld [vmem:[%s4452_s8 + $0x18] sm:$0xff]  }
 0x454   :  { %2996 = vmatprep.subr.bf16.mxu0 %v3072_v4 }
 0x455   :  { %v1352_v13 = vadd.f32 %v3818_v18, %v1351_v57  ;;  %v1420_v61 = vadd.f32 %v1419_v55, %v1389_v15  ;;  %v3075_v55 = vld [vmem:[%s4452_s8 + $0x20] sm:$0xff]  }
 0x456   :  { %v1433_v57 = vld [vmem:[%s4450_s6] sm:$0x1] }
 0x457   :  { %v1353_v37 = vadd.f32 %v3826_v46, %v1352_v13  ;;  %v1421_v52 = vadd.f32 %v1420_v61, %v1390_v1  ;;  %2997 = vmatpush3.bf16.msra.mxu0 %v3072_v4  ;;  %v3076_v13 = vld [vmem:[%s4452_s8 + $0x28] sm:$0xff]   ;;  %v1437_v61 = vld [vmem:[%s4451_s7] sm:$0x1] }
 0x458   :  { %2998 = vmatprep.subr.bf16.mxu0 %v3073_v31 }
 0x459   :  { %v1354_v63 = vrot.slane %v1353_v37, 4  ;;  %v1422_v5 = vadd.f32 %v1421_v52, %v1391_v62 }
 0x45b   :  { %v1355_v59 = vadd.f32 %v1354_v63, %v1353_v37  ;;  %v1423_v40 = vrot.slane %v1422_v5, 4  ;;  %2999 = vmatpush3.bf16.msra.mxu0 %v3073_v31 }
 0x45c   :  { %3000 = vmatprep.subr.bf16.mxu0 %v3074_v38 }
 0x45d   :  { %v1356_v21 = vrot.slane %v1355_v59, 2  ;;  %v1424_v26 = vadd.f32 %v1423_v40, %v1422_v5  ;;  %v3077_v40 = vld [vmem:[%s4452_s8 + $0x30] sm:$0xff]  }
 0x45f   :  { %v1357_v60 = vadd.f32 %v1356_v21, %v1355_v59  ;;  %v1425_v56 = vrot.slane %v1424_v26, 2  ;;  %3001 = vmatpush3.bf16.msra.mxu0 %v3074_v38 }
 0x460   :  { %3002 = vmatprep.subr.bf16.mxu0 %v3075_v55 }
 0x461   :  { %v1358_v53 = vrot.slane %v1357_v60, 1  ;;  %v1426_v22 = vadd.f32 %v1425_v56, %v1424_v26 }
 0x463   :  { %v1359_v51 = vadd.f32 %v1358_v53, %v1357_v60  ;;  %v1427_v11 = vrot.slane %v1426_v22, 1  ;;  %3003 = vmatpush3.bf16.msra.mxu0 %v3075_v55 }
 0x464   :  { %3004 = vmatprep.subr.bf16.mxu0 %v3076_v13 }
 0x465   :  { %v1428_v42 = vadd.f32 %v1427_v11, %v1426_v22  ;;  %v1429_v2 = vmul.f32 0.0625, %v1359_v51 }
 0x467   :  { %v1430_v44 = vmul.f32 0.0625, %v1428_v42  ;;  %v1431_v48 = vmul.f32 %v1429_v2, %v1429_v2  ;;  %3005 = vmatpush3.bf16.msra.mxu0 %v3076_v13 }
 0x468   :  { %3006 = vmatprep.subr.bf16.mxu0 %v3077_v40 }
 0x469   :  { %v1432_v23 = vsub.f32 %v1430_v44, %v1431_v48 }
 0x46b   :  { %v1434_v29 = vadd.f32 1e-05, %v1432_v23  ;;  %3007 = vmatpush3.bf16.msra.mxu0 %v3077_v40 }
 0x46d   :  { %3081 = vrsqrt.f32 %v1434_v29 }
 0x477   :  { %v3082_v15 = vpop.eup %3081 }
 0x478   :  { %v1436_v1 = vmul.f32 %v3082_v15, %v1433_v57 }
 0x47a   :  { %v1438_v62 = vmul.f32 %v1436_v1, %v1429_v2  ;;  %v1444_v37 = vrot.slane %v1436_v1, %v3577_v41 }
 0x47c   :  { %v1439_v52 = vsub.f32 %v1437_v61, %v1438_v62  ;;  %v1475_v63 = vmul.f32 %v1444_v37, %v1311_v54  ;;  %v1446_v5 = vmul.f32 %v1444_v37, %v3681_v12  ;;  %v1447_v59 = vmul.f32 %v1444_v37, %v3685_v20 }
 0x47d   :  { %v1448_v21 = vmul.f32 %v3679_v8, %v1444_v37  ;;  %v1449_v26 = vmul.f32 %v3683_v10, %v1444_v37  ;;  %v1450_v60 = vmul.f32 %v1444_v37, %v3701_v47  ;;  %v1451_v56 = vmul.f32 %v1444_v37, %v3708_v58 }
 0x47e   :  { %v3869_v53 = vrot.slane %v1439_v52, %v3577_v41  ;;  %v1452_v12 = vmul.f32 %v3698_v39, %v1444_v37  ;;  %v1453_v20 = vmul.f32 %v3706_v14, %v1444_v37  ;;  %v1454_v54 = vmul.f32 %v1444_v37, %v3721_v36  ;;  %v3078_v36 = vld [vmem:[%s4452_s8 + $0x38] sm:$0xff]  }
 0x47f   :  { %v1455_v22 = vmul.f32 %v1444_v37, %v3728_v50  ;;  %v1456_v51 = vmul.f32 %v3718_v32, %v1444_v37  ;;  %v1457_v8 = vmul.f32 %v3726_v6, %v1444_v37  ;;  %v1458_v10 = vmul.f32 %v1444_v37, %v3741_v43  ;;  %3008 = vmatprep.subr.bf16.mxu0 %v3078_v36 }
 0x480   :  { %v3879_v47 = vadd.f32 %v3869_v53, %v1475_v63  ;;  %v1459_v58 = vmul.f32 %v1444_v37, %v3748_v33  ;;  %v1460_v39 = vmul.f32 %v3738_v45, %v1444_v37  ;;  %v1461_v14 = vmul.f32 %v3746_v30, %v1444_v37  ;;  %3009 = vmatpush3.bf16.msra.mxu0 %v3078_v36 }
 0x481   :  { %v1462_v32 = vmul.f32 %v1444_v37, %v3761_v9  ;;  %v1463_v6 = vmul.f32 %v1444_v37, %v3768_v34  ;;  %v1464_v50 = vmul.f32 %v3758_v19, %v1444_v37  ;;  %v1465_v43 = vmul.f32 %v3766_v27, %v1444_v37 }
 0x482   :  { %v1466_v11 = vmul.f32 %v1444_v37, %v3781_v3  ;;  %v1467_v33 = vmul.f32 %v1444_v37, %v3788_v28  ;;  %v1468_v45 = vmul.f32 %v3778_v35, %v1444_v37  ;;  %v1469_v30 = vmul.f32 %v3786_v0, %v1444_v37 }
 0x483   :  { %v1470_v42 = vmul.f32 %v1444_v37, %v3801_v25  ;;  %v1471_v2 = vmul.f32 %v1444_v37, %v3808_v7  ;;  %v1472_v9 = vmul.f32 %v3798_v17, %v1444_v37  ;;  %v1473_v34 = vmul.f32 %v3806_v16, %v1444_v37 }
 0x484   :  { %v1474_v19 = vmul.f32 %v1444_v37, %v3821_v24  ;;  %v1476_v27 = vmul.f32 %v3818_v18, %v1444_v37  ;;  %v1477_v3 = vmul.f32 %v3826_v46, %v1444_v37  ;;  %v1484_v28 = vadd.f32 %v3869_v53, %v1446_v5 }
 0x485   :  { %v1485_v35 = vadd.f32 %v3869_v53, %v1447_v59  ;;  %v1486_v0 = vadd.f32 %v3869_v53, %v1448_v21  ;;  %v1487_v25 = vadd.f32 %v3869_v53, %v1449_v26  ;;  %v1488_v17 = vadd.f32 %v3869_v53, %v1450_v60 }
 0x486   :  { %v1489_v16 = vadd.f32 %v3869_v53, %v1451_v56  ;;  %v1490_v7 = vadd.f32 %v3869_v53, %v1452_v12  ;;  %v1491_v24 = vadd.f32 %v3869_v53, %v1453_v20  ;;  %v1492_v18 = vadd.f32 %v3869_v53, %v1454_v54 }
 0x487   :  { %v1493_v46 = vadd.f32 %v3869_v53, %v1455_v22  ;;  %v1494_v44 = vadd.f32 %v3869_v53, %v1456_v51  ;;  %v1495_v48 = vadd.f32 %v3869_v53, %v1457_v8  ;;  %v1496_v49 = vadd.f32 %v3869_v53, %v1458_v10 }
 0x488   :  { %v1497_v4 = vadd.f32 %v3869_v53, %v1459_v58  ;;  %v1498_v23 = vadd.f32 %v3869_v53, %v1460_v39  ;;  %v1499_v29 = vadd.f32 %v3869_v53, %v1461_v14  ;;  %v1500_v31 = vadd.f32 %v3869_v53, %v1462_v32 }
 0x489   :  { %v1501_v38 = vadd.f32 %v3869_v53, %v1463_v6  ;;  %v1502_v55 = vadd.f32 %v3869_v53, %v1464_v50  ;;  %v1503_v57 = vadd.f32 %v3869_v53, %v1465_v43  ;;  %v1504_v15 = vadd.f32 %v3869_v53, %v1466_v11 }
 0x48a   :  { %v1505_v1 = vadd.f32 %v3869_v53, %v1467_v33  ;;  %v1506_v13 = vadd.f32 %v3869_v53, %v1468_v45  ;;  %v1507_v61 = vadd.f32 %v3869_v53, %v1469_v30  ;;  %v1508_v62 = vadd.f32 %v3869_v53, %v1470_v42 }
 0x48b   :  { %v1509_v37 = vadd.f32 %v3869_v53, %v1471_v2  ;;  %v1510_v52 = vadd.f32 %v3869_v53, %v1472_v9  ;;  %v1511_v63 = vadd.f32 %v3869_v53, %v1473_v34  ;;  %v1512_v5 = vadd.f32 %v3869_v53, %v1474_v19 }
 0x48c   :  { %v1514_v59 = vadd.f32 %v3869_v53, %v1476_v27  ;;  %v1515_v40 = vadd.f32 %v3869_v53, %v1477_v3  ;;  %v1516_v21 = vmax.f32 %v1484_v28, 0.0  ;;  %v1517_v26 = vmax.f32 %v1485_v35, 0.0 }
 0x48d   :  { %v1518_v60 = vmax.f32 %v1486_v0, 0.0  ;;  %v1519_v56 = vmax.f32 %v1487_v25, 0.0  ;;  %v1520_v12 = vmax.f32 %v1488_v17, 0.0  ;;  %v1521_v20 = vmax.f32 %v1489_v16, 0.0 }
 0x48e   :  { %v1548_v54 = vpack.c.bf16 %v1517_v26, %v1516_v21  ;;  %v1522_v22 = vmax.f32 %v1490_v7, 0.0  ;;  %v1523_v51 = vmax.f32 %v1491_v24, 0.0  ;;  %v1524_v8 = vmax.f32 %v1492_v18, 0.0  ;;  %v2226_v21 = vld [vmem:[%s4455_s11 + $0x10] sm:$0xff]  ;;  %v2224_v26 = vld [vmem:[%s4455_s11] sm:$0xff] }
 0x48f   :  { %v1549_v10 = vpack.c.bf16 %v1519_v56, %v1518_v60  ;;  %v1550_v58 = vpack.c.bf16 %v1521_v20, %v1520_v12  ;;  %v1525_v39 = vmax.f32 %v1493_v46, 0.0  ;;  %v1526_v14 = vmax.f32 %v1494_v44, 0.0  ;;  %v2227_v56 = vld [vmem:[%s4455_s11 + $0x18] sm:$0xff]  ;;  %v2225_v12 = vld [vmem:[%s4455_s11 + $0x8] sm:$0xff]  ;;  %v2240_v20 = vld [vmem:[%s4455_s11 + $0x80] sm:$0xff] }
 0x490   :  { %2930 = vmatprep.subr.bf16.mxu1 %v1548_v54  ;;  %v1551_v36 = vpack.c.bf16 %v1523_v51, %v1522_v22  ;;  %v1527_v32 = vmax.f32 %v1495_v48, 0.0  ;;  %v1528_v6 = vmax.f32 %v1496_v49, 0.0  ;;  %v1529_v50 = vmax.f32 %v1497_v4, 0.0  ;;  %v2242_v22 = vld [vmem:[%s4455_s11 + $0x90] sm:$0xff]  ;;  %v2241_v51 = vld [vmem:[%s4455_s11 + $0x88] sm:$0xff] }
 0x491   :  { %2931 = vmatpush3.bf16.msra.mxu1 %v1548_v54  ;;  %v1552_v53 = vpack.c.bf16 %v1525_v39, %v1524_v8  ;;  %v1530_v43 = vmax.f32 %v1498_v23, 0.0  ;;  %v1531_v11 = vmax.f32 %v1499_v29, 0.0  ;;  %v1532_v33 = vmax.f32 %v1500_v31, 0.0  ;;  %v2228_v54 = vld [vmem:[%s4455_s11 + $0x20] sm:$0xff]  ;;  %v2229_v39 = vld [vmem:[%s4455_s11 + $0x28] sm:$0xff] }
 0x492   :  { %2932 = vmatprep.subr.bf16.mxu1 %v1549_v10  ;;  %v1553_v45 = vpack.c.bf16 %v1527_v32, %v1526_v14  ;;  %v1554_v30 = vpack.c.bf16 %v1529_v50, %v1528_v6  ;;  %v1533_v42 = vmax.f32 %v1501_v38, 0.0  ;;  %v1534_v2 = vmax.f32 %v1502_v55, 0.0  ;;  %v3087_v38 = vld [vmem:[%s4444_s0 + $0x10] sm:$0xff]   ;;  %v3088_v55 = vld [vmem:[%s4444_s0 + $0x18] sm:$0xff]   ;;  %v2244_v8 = vld [vmem:[%s4455_s11 + $0xa0] sm:$0xff] }
 0x493   :  { %v1555_v9 = vpack.c.bf16 %v1531_v11, %v1530_v43  ;;  %v1535_v34 = vmax.f32 %v1503_v57, 0.0  ;;  %v1536_v19 = vmax.f32 %v1504_v15, 0.0  ;;  %v1537_v27 = vmax.f32 %v1505_v1, 0.0  ;;  %v3089_v57 = vld [vmem:[%s4444_s0 + $0x20] sm:$0xff]   ;;  %v3090_v15 = vld [vmem:[%s4444_s0 + $0x28] sm:$0xff]   ;;  %v3091_v1 = vld [vmem:[%s4444_s0 + $0x30] sm:$0xff]  }
 0x494   :  { %v1556_v3 = vpack.c.bf16 %v1533_v42, %v1532_v33  ;;  %v1538_v28 = vmax.f32 %v1506_v13, 0.0  ;;  %v1539_v35 = vmax.f32 %v1507_v61, 0.0  ;;  %v1540_v0 = vmax.f32 %v1508_v62, 0.0  ;;  %v3092_v13 = vld [vmem:[%s4444_s0 + $0x38] sm:$0xff]   ;;  %v3093_v61 = vld [vmem:[%s4444_s0 + $0x40] sm:$0xff]   ;;  %v3094_v62 = vld [vmem:[%s4444_s0 + $0x48] sm:$0xff]  }
 0x495   :  { %2933 = vmatpush3.bf16.msra.mxu1 %v1549_v10  ;;  %v1557_v25 = vpack.c.bf16 %v1535_v34, %v1534_v2  ;;  %v1558_v17 = vpack.c.bf16 %v1537_v27, %v1536_v19  ;;  %v1541_v16 = vmax.f32 %v1509_v37, 0.0  ;;  %v1542_v7 = vmax.f32 %v1510_v52, 0.0  ;;  %v3095_v37 = vld [vmem:[%s4444_s0 + $0x50] sm:$0xff]   ;;  %v3096_v52 = vld [vmem:[%s4444_s0 + $0x58] sm:$0xff]   ;;  %v2248_v50 = vld [vmem:[%s4455_s11 + $0xc0] sm:$0xff] }
 0x496   :  { %2934 = vmatprep.subr.bf16.mxu1 %v1550_v58  ;;  %v1559_v24 = vpack.c.bf16 %v1539_v35, %v1538_v28  ;;  %v1543_v18 = vmax.f32 %v1511_v63, 0.0  ;;  %v1544_v46 = vmax.f32 %v1512_v5, 0.0  ;;  %v1545_v44 = vmax.f32 %v3879_v47, 0.0  ;;  %v3086_v47 = vld [vmem:[%s4444_s0 + $0x8] sm:$0xff]   ;;  %v3097_v63 = vld [vmem:[%s4444_s0 + $0x60] sm:$0xff]   ;;  %v2243_v10 = vld [vmem:[%s4455_s11 + $0x98] sm:$0xff] }
 0x497   :  { %v1560_v48 = vpack.c.bf16 %v1541_v16, %v1540_v0  ;;  %v1546_v49 = vmax.f32 %v1514_v59, 0.0  ;;  %v1547_v4 = vmax.f32 %v1515_v40, 0.0  ;;  %v3098_v5 = vld [vmem:[%s4444_s0 + $0x68] sm:$0xff]   ;;  %v3099_v59 = vld [vmem:[%s4444_s0 + $0x70] sm:$0xff]   ;;  %v3100_v40 = vld [vmem:[%s4444_s0 + $0x78] sm:$0xff]   ;;  %v3125_v60 = vmov 0  }
 0x498   :  { %v1561_v23 = vpack.c.bf16 %v1543_v18, %v1542_v7  ;;  %v1562_v29 = vpack.c.bf16 %v1545_v44, %v1544_v46  ;;  %3045 = vset.pattern.permute.xlu1 %v3125_v60  ;;  %3044 = vset.pattern.permute.xlu0 %v3125_v60  ;;  %v2246_v14 = vld [vmem:[%s4455_s11 + $0xb0] sm:$0xff]  ;;  %v2247_v32 = vld [vmem:[%s4455_s11 + $0xb8] sm:$0xff]  ;;  %v2249_v43 = vld [vmem:[%s4455_s11 + $0xc8] sm:$0xff] }
 0x499   :  { %2935 = vmatpush3.bf16.msra.mxu1 %v1550_v58  ;;  %v1563_v31 = vpack.c.bf16 %v1547_v4, %v1546_v49  ;;  %2268 = vperm.xlu1 %3045, %v2226_v21   ;;  %v2245_v58 = vld [vmem:[%s4455_s11 + $0xa8] sm:$0xff]  ;;  %v2231_v6 = vld [vmem:[%s4455_s11 + $0x38] sm:$0xff]  ;;  %v2250_v33 = vld [vmem:[%s4455_s11 + $0xd0] sm:$0xff] }
 0x49a   :  { %2936 = vmatprep.subr.bf16.mxu1 %v1551_v36  ;;  %2258 = vperm.xlu0 %3044, %v2224_v26   ;;  %v2233_v11 = vld [vmem:[%s4455_s11 + $0x48] sm:$0xff]  ;;  %v2235_v42 = vld [vmem:[%s4455_s11 + $0x58] sm:$0xff]  ;;  %v2252_v2 = vld [vmem:[%s4455_s11 + $0xe0] sm:$0xff] }
 0x49b   :  { %v2253_v34 = vld [vmem:[%s4455_s11 + $0xe8] sm:$0xff]  ;;  %v2254_v27 = vld [vmem:[%s4455_s11 + $0xf0] sm:$0xff]  ;;  %v2255_v28 = vld [vmem:[%s4455_s11 + $0xf8] sm:$0xff] }
 0x49c   :  { %v2237_v19 = vld [vmem:[%s4455_s11 + $0x68] sm:$0xff]  ;;  %v2239_v35 = vld [vmem:[%s4455_s11 + $0x78] sm:$0xff] }
 0x49d   :  { %2937 = vmatpush3.bf16.msra.mxu1 %v1551_v36  ;;  %2273 = vperm.xlu1 %3045, %v2227_v56   ;;  %v2230_v36 = vld [vmem:[%s4455_s11 + $0x30] sm:$0xff] }
 0x49e   :  { %2938 = vmatprep.subr.bf16.mxu1 %v1552_v53  ;;  %2263 = vperm.xlu0 %3044, %v2225_v12  }
 0x4a1   :  { %2939 = vmatpush3.bf16.msra.mxu1 %v1552_v53  ;;  %2338 = vperm.xlu1 %3045, %v2240_v20   ;;  %v2232_v53 = vld [vmem:[%s4455_s11 + $0x40] sm:$0xff] }
 0x4a2   :  { %2940 = vmatprep.subr.bf16.mxu1 %v1553_v45  ;;  %2278 = vperm.xlu0 %3044, %v2228_v54  }
 0x4a5   :  { %2941 = vmatpush3.bf16.msra.mxu1 %v1553_v45  ;;  %2348 = vperm.xlu1 %3045, %v2242_v22   ;;  %v2234_v45 = vld [vmem:[%s4455_s11 + $0x50] sm:$0xff] }
 0x4a6   :  { %2942 = vmatprep.subr.bf16.mxu1 %v1554_v30  ;;  %2343 = vperm.xlu0 %3044, %v2241_v51  }
 0x4a9   :  { %2943 = vmatpush3.bf16.msra.mxu1 %v1554_v30  ;;  %2358 = vperm.xlu1 %3045, %v2244_v8   ;;  %v2251_v30 = vld [vmem:[%s4455_s11 + $0xd8] sm:$0xff] }
 0x4aa   :  { %2944 = vmatprep.subr.bf16.mxu1 %v1555_v9  ;;  %2353 = vperm.xlu0 %3044, %v2243_v10  }
 0x4ad   :  { %2945 = vmatpush3.bf16.msra.mxu1 %v1555_v9  ;;  %2363 = vperm.xlu1 %3045, %v2245_v58   ;;  %v2236_v9 = vld [vmem:[%s4455_s11 + $0x60] sm:$0xff] }
 0x4ae   :  { %2962 = vmatprep.subr.bf16.mxu1 %v1556_v3  ;;  %2283 = vperm.xlu0 %3044, %v2229_v39  }
 0x4b0   :  { %2947 = vmatmul.mubr.bf16.vlgmr.msra.gmra.mrb[64].mxu1 %v3086_v47 }
 0x4b1   :  { %2963 = vmatpush3.bf16.msra.mxu1 %v1556_v3  ;;  %2950 = vmatprep.mubr.bf16.mxu1 %v3087_v38  ;;  %v2238_v3 = vld [vmem:[%s4455_s11 + $0x70] sm:$0xff] }
 0x4b2   :  { %2964 = vmatprep.subr.bf16.mxu1 %v1557_v25  ;;  %2368 = vperm.xlu1 %3045, %v2246_v14  }
 0x4b3   :  { %2288 = vperm.xlu0 %3044, %v2230_v36  }
 0x4b5   :  { %2965 = vmatpush3.bf16.msra.mxu1 %v1557_v25 }
 0x4b6   :  { %2966 = vmatprep.subr.bf16.mxu1 %v1558_v17  ;;  %2373 = vperm.xlu1 %3045, %v2247_v32  }
 0x4b7   :  { %2293 = vperm.xlu0 %3044, %v2231_v6  }
 0x4b8   :  { %2951 = vmatmul.mubr.bf16.gmra.mrb[68].mxu1 %v3088_v55 }
 0x4b9   :  { %2967 = vmatpush3.bf16.msra.mxu1 %v1558_v17  ;;  %2954 = vmatprep.mubr.bf16.mxu1 %v3089_v57 }
 0x4ba   :  { %2968 = vmatprep.subr.bf16.mxu1 %v1559_v24  ;;  %2378 = vperm.xlu1 %3045, %v2248_v50  }
 0x4bb   :  { %2298 = vperm.xlu0 %3044, %v2232_v53  }
 0x4bd   :  { %2969 = vmatpush3.bf16.msra.mxu1 %v1559_v24 }
 0x4be   :  { %2970 = vmatprep.subr.bf16.mxu1 %v1560_v48  ;;  %2383 = vperm.xlu1 %3045, %v2249_v43  }
 0x4bf   :  { %2303 = vperm.xlu0 %3044, %v2233_v11  }
 0x4c0   :  { %2955 = vmatmul.mubr.bf16.gmra.mrb[72].mxu1 %v3090_v15 }
 0x4c1   :  { %2971 = vmatpush3.bf16.msra.mxu1 %v1560_v48  ;;  %2958 = vmatprep.mubr.bf16.mxu1 %v3091_v1 }
 0x4c2   :  { %2972 = vmatprep.subr.bf16.mxu1 %v1561_v23  ;;  %2388 = vperm.xlu1 %3045, %v2250_v33  }
 0x4c3   :  { %2308 = vperm.xlu0 %3044, %v2234_v45  }
 0x4c5   :  { %2973 = vmatpush3.bf16.msra.mxu1 %v1561_v23 }
 0x4c6   :  { %2974 = vmatprep.subr.bf16.mxu1 %v1562_v29  ;;  %2393 = vperm.xlu1 %3045, %v2251_v30  }
 0x4c7   :  { %2313 = vperm.xlu0 %3044, %v2235_v42  }
 0x4c8   :  { %2959 = vmatmul.mubr.bf16.gmra.mrb[76].mxu1 %v3092_v13 }
 0x4c9   :  { %2975 = vmatpush3.bf16.msra.mxu1 %v1562_v29  ;;  %2978 = vmatprep.mubr.bf16.mxu1 %v3093_v61 }
 0x4ca   :  { %2976 = vmatprep.subr.bf16.mxu1 %v1563_v31  ;;  %2398 = vperm.xlu1 %3045, %v2252_v2  }
 0x4cb   :  { %2318 = vperm.xlu0 %3044, %v2236_v9  }
 0x4cd   :  { %2977 = vmatpush3.bf16.msra.mxu1 %v1563_v31 }
 0x4ce   :  { %2403 = vperm.xlu1 %3045, %v2253_v34  }
 0x4cf   :  { %2323 = vperm.xlu0 %3044, %v2237_v19  }
 0x4d0   :  { %2979 = vmatmul.mubr.bf16.vlgmr.msra.gmra.mrb[80].mxu1 %v3094_v62 }
 0x4d1   :  { %2982 = vmatprep.mubr.bf16.mxu1 %v3095_v37 }
 0x4d2   :  { %2408 = vperm.xlu1 %3045, %v2254_v27  }
 0x4d3   :  { %2328 = vperm.xlu0 %3044, %v2238_v3  }
 0x4d6   :  { %2413 = vperm.xlu1 %3045, %v2255_v28  }
 0x4d7   :  { %2333 = vperm.xlu0 %3044, %v2239_v35  }
 0x4d8   :  { %2983 = vmatmul.mubr.bf16.gmra.mrb[84].mxu1 %v3096_v52 }
 0x4d9   :  { %2986 = vmatprep.mubr.bf16.mxu1 %v3097_v63 }
 0x4e0   :  { %2987 = vmatmul.mubr.bf16.gmra.mrb[88].mxu1 %v3098_v5 }
 0x4e1   :  { %2990 = vmatprep.mubr.bf16.mxu1 %v3099_v59 }
 0x4e8   :  { %2991 = vmatmul.mubr.bf16.gmra.mrb[92].mxu1 %v3100_v40 }
 0x583   :  { %v2948_v0 = vpop.f32.mrb[64].mxu1 }
 0x584   :  { %v1598_v25 = vpop.f32.mrb[65].mxu1 }
 0x585   :  { %v2949_v17 = vpop.f32.mrb[66].mxu1 }
 0x586   :  { %v1759_v16 = vpack.c.bf16 %v2949_v17, %v2948_v0  ;;  %v1601_v7 = vpop.f32.mrb[67].mxu1 }
 0x587   :  { %v1758_v24 = vpack.c.bf16 %v1601_v7, %v1598_v25 }
 0x589   :  { %3010 = vmatprep.mubr.bf16.mxu0 %v1758_v24 }
 0x58a   :  { %3011 = vmatmul.mubr.bf16.vlgmr.msra.gmra.mrb[64].mxu0 %v1759_v16 }
 0x58b   :  { %v2952_v18 = vpop.f32.mrb[68].mxu1 }
 0x58c   :  { %v1614_v46 = vpop.f32.mrb[69].mxu1 }
 0x58d   :  { %v2953_v44 = vpop.f32.mrb[70].mxu1 }
 0x58e   :  { %v1761_v48 = vpack.c.bf16 %v2953_v44, %v2952_v18  ;;  %v1617_v49 = vpop.f32.mrb[71].mxu1 }
 0x58f   :  { %v1760_v4 = vpack.c.bf16 %v1617_v49, %v1614_v46 }
 0x591   :  { %3014 = vmatprep.mubr.bf16.mxu0 %v1760_v4 }
 0x592   :  { %3015 = vmatmul.mubr.bf16.gmra.mrb[68].mxu0 %v1761_v48 }
 0x593   :  { %v2956_v23 = vpop.f32.mrb[72].mxu1 }
 0x594   :  { %v1630_v29 = vpop.f32.mrb[73].mxu1 }
 0x595   :  { %v2957_v31 = vpop.f32.mrb[74].mxu1 }
 0x596   :  { %v1763_v47 = vpack.c.bf16 %v2957_v31, %v2956_v23  ;;  %v1633_v38 = vpop.f32.mrb[75].mxu1 }
 0x597   :  { %v1762_v55 = vpack.c.bf16 %v1633_v38, %v1630_v29 }
 0x599   :  { %3018 = vmatprep.mubr.bf16.mxu0 %v1762_v55 }
 0x59a   :  { %3019 = vmatmul.mubr.bf16.gmra.mrb[72].mxu0 %v1763_v47 }
 0x59b   :  { %v2960_v57 = vpop.f32.mrb[76].mxu1 }
 0x59c   :  { %v1646_v15 = vpop.f32.mrb[77].mxu1 }
 0x59d   :  { %v2961_v1 = vpop.f32.mrb[78].mxu1 }
 0x59e   :  { %v1765_v13 = vpack.c.bf16 %v2961_v1, %v2960_v57  ;;  %v1649_v61 = vpop.f32.mrb[79].mxu1 }
 0x59f   :  { %v1764_v62 = vpack.c.bf16 %v1649_v61, %v1646_v15 }
 0x5a1   :  { %3022 = vmatprep.mubr.bf16.mxu0 %v1764_v62 }
 0x5a2   :  { %3023 = vmatmul.mubr.bf16.gmra.mrb[76].mxu0 %v1765_v13 }
 0x5a3   :  { %v2980_v37 = vpop.f32.mrb[80].mxu1 }
 0x5a4   :  { %v1695_v52 = vpop.f32.mrb[81].mxu1 }
 0x5a5   :  { %v2981_v63 = vpop.f32.mrb[82].mxu1 }
 0x5a6   :  { %v1767_v5 = vpack.c.bf16 %v2981_v63, %v2980_v37  ;;  %v1698_v59 = vpop.f32.mrb[83].mxu1 }
 0x5a7   :  { %v1766_v40 = vpack.c.bf16 %v1698_v59, %v1695_v52 }
 0x5a9   :  { %3026 = vmatprep.mubr.bf16.mxu0 %v1766_v40 }
 0x5aa   :  { %3027 = vmatmul.mubr.bf16.gmra.mrb[80].mxu0 %v1767_v5 }
 0x5ab   :  { %v2984_v21 = vpop.f32.mrb[84].mxu1 }
 0x5ac   :  { %v1711_v26 = vpop.f32.mrb[85].mxu1 }
 0x5ad   :  { %v2985_v60 = vpop.f32.mrb[86].mxu1 }
 0x5ae   :  { %v1769_v56 = vpack.c.bf16 %v2985_v60, %v2984_v21  ;;  %v1714_v12 = vpop.f32.mrb[87].mxu1 }
 0x5af   :  { %v1768_v20 = vpack.c.bf16 %v1714_v12, %v1711_v26 }
 0x5b1   :  { %3030 = vmatprep.mubr.bf16.mxu0 %v1768_v20 }
 0x5b2   :  { %3031 = vmatmul.mubr.bf16.gmra.mrb[84].mxu0 %v1769_v56 }
 0x5b3   :  { %v2988_v54 = vpop.f32.mrb[88].mxu1 }
 0x5b4   :  { %v1727_v22 = vpop.f32.mrb[89].mxu1 }
 0x5b5   :  { %v2989_v51 = vpop.f32.mrb[90].mxu1 }
 0x5b6   :  { %v1771_v8 = vpack.c.bf16 %v2989_v51, %v2988_v54  ;;  %v1730_v10 = vpop.f32.mrb[91].mxu1 }
 0x5b7   :  { %v1770_v58 = vpack.c.bf16 %v1730_v10, %v1727_v22 }
 0x5b9   :  { %3034 = vmatprep.mubr.bf16.mxu0 %v1770_v58 }
 0x5ba   :  { %3035 = vmatmul.mubr.bf16.gmra.mrb[88].mxu0 %v1771_v8 }
 0x5bb   :  { %v2992_v39 = vpop.f32.mrb[92].mxu1 }
 0x5bc   :  { %v1743_v14 = vpop.f32.mrb[93].mxu1 }
 0x5bd   :  { %v2993_v36 = vpop.f32.mrb[94].mxu1 }
 0x5be   :  { %v1773_v32 = vpack.c.bf16 %v2993_v36, %v2992_v39  ;;  %v1746_v6 = vpop.f32.mrb[95].mxu1 }
 0x5bf   :  { %v1772_v50 = vpack.c.bf16 %v1746_v6, %v1743_v14 }
 0x5c1   :  { %3038 = vmatprep.mubr.bf16.mxu0 %v1772_v50 }
 0x5c2   :  { %3039 = vmatmul.mubr.bf16.gmra.mrb[92].mxu0 %v1773_v32 }
 0x65d   :  { %v4075_v53 = vpop.f32.mrb[64].mxu0 }
 0x65e   :  { %v4077_v43 = vpop.f32.mrb[65].mxu0  ;;  %v2038_v2 = vmul.f32 %v4075_v53, %v4075_v53 }
 0x65f   :  { %v4079_v11 = vpop.f32.mrb[66].mxu0  ;;  %v2036_v45 = vmul.f32 %v4077_v43, %v4077_v43 }
 0x660   :  { %v4081_v33 = vpop.f32.mrb[67].mxu0  ;;  %v2039_v19 = vmul.f32 %v4079_v11, %v4079_v11 }
 0x661   :  { %v1999_v30 = vadd.f32 %v4081_v33, %v4077_v43  ;;  %v2037_v42 = vmul.f32 %v4081_v33, %v4081_v33 }
 0x663   :  { %v2000_v9 = vadd.f32 %v4075_v53, %v1999_v30  ;;  %v2068_v34 = vadd.f32 %v2037_v42, %v2036_v45 }
 0x665   :  { %v2069_v27 = vadd.f32 %v2068_v34, %v2038_v2  ;;  %v4094_v3 = vpop.f32.mrb[68].mxu0  ;;  %v2001_v28 = vadd.f32 %v4079_v11, %v2000_v9 }
 0x666   :  { %v4097_v35 = vpop.f32.mrb[69].mxu0  ;;  %v2042_v44 = vmul.f32 %v4094_v3, %v4094_v3 }
 0x667   :  { %v2002_v0 = vadd.f32 %v2001_v28, %v4097_v35  ;;  %v2040_v25 = vmul.f32 %v4097_v35, %v4097_v35  ;;  %v2070_v17 = vadd.f32 %v2069_v27, %v2039_v19  ;;  %v4102_v16 = vpop.f32.mrb[70].mxu0 }
 0x668   :  { %v4104_v7 = vpop.f32.mrb[71].mxu0  ;;  %v2043_v4 = vmul.f32 %v4102_v16, %v4102_v16 }
 0x669   :  { %v2071_v24 = vadd.f32 %v2070_v17, %v2040_v25  ;;  %v2003_v18 = vadd.f32 %v2002_v0, %v4104_v7  ;;  %v2041_v46 = vmul.f32 %v4104_v7, %v4104_v7 }
 0x66b   :  { %v2004_v48 = vadd.f32 %v4094_v3, %v2003_v18  ;;  %v2072_v49 = vadd.f32 %v2071_v24, %v2041_v46 }
 0x66d   :  { %v2073_v23 = vadd.f32 %v2072_v49, %v2042_v44  ;;  %v4114_v29 = vpop.f32.mrb[72].mxu0  ;;  %v2005_v31 = vadd.f32 %v4102_v16, %v2004_v48 }
 0x66e   :  { %v4117_v47 = vpop.f32.mrb[73].mxu0  ;;  %v2046_v37 = vmul.f32 %v4114_v29, %v4114_v29 }
 0x66f   :  { %v2006_v38 = vadd.f32 %v2005_v31, %v4117_v47  ;;  %v2044_v55 = vmul.f32 %v4117_v47, %v4117_v47  ;;  %v2074_v57 = vadd.f32 %v2073_v23, %v2043_v4  ;;  %v4122_v15 = vpop.f32.mrb[74].mxu0 }
 0x670   :  { %v4124_v1 = vpop.f32.mrb[75].mxu0  ;;  %v2047_v5 = vmul.f32 %v4122_v15, %v4122_v15 }
 0x671   :  { %v2075_v13 = vadd.f32 %v2074_v57, %v2044_v55  ;;  %v2007_v61 = vadd.f32 %v2006_v38, %v4124_v1  ;;  %v2045_v62 = vmul.f32 %v4124_v1, %v4124_v1 }
 0x673   :  { %v2008_v52 = vadd.f32 %v4114_v29, %v2007_v61  ;;  %v2076_v63 = vadd.f32 %v2075_v13, %v2045_v62 }
 0x675   :  { %v2077_v59 = vadd.f32 %v2076_v63, %v2046_v37  ;;  %v4134_v40 = vpop.f32.mrb[76].mxu0  ;;  %v2009_v21 = vadd.f32 %v4122_v15, %v2008_v52 }
 0x676   :  { %v4137_v26 = vpop.f32.mrb[77].mxu0  ;;  %v2050_v10 = vmul.f32 %v4134_v40, %v4134_v40 }
 0x677   :  { %v2010_v60 = vadd.f32 %v2009_v21, %v4137_v26  ;;  %v2048_v56 = vmul.f32 %v4137_v26, %v4137_v26  ;;  %v2078_v12 = vadd.f32 %v2077_v59, %v2047_v5  ;;  %v4142_v20 = vpop.f32.mrb[78].mxu0 }
 0x678   :  { %v4144_v54 = vpop.f32.mrb[79].mxu0  ;;  %v2051_v14 = vmul.f32 %v4142_v20, %v4142_v20 }
 0x679   :  { %v2079_v22 = vadd.f32 %v2078_v12, %v2048_v56  ;;  %v2011_v51 = vadd.f32 %v2010_v60, %v4144_v54  ;;  %v2049_v8 = vmul.f32 %v4144_v54, %v4144_v54 }
 0x67b   :  { %v2012_v58 = vadd.f32 %v4134_v40, %v2011_v51  ;;  %v2080_v39 = vadd.f32 %v2079_v22, %v2049_v8 }
 0x67d   :  { %v2081_v36 = vadd.f32 %v2080_v39, %v2050_v10  ;;  %v4154_v32 = vpop.f32.mrb[80].mxu0  ;;  %v2013_v6 = vadd.f32 %v4142_v20, %v2012_v58  ;;  %v4209_v58 = vpop.permute.xlu1 %2268 }
 0x67e   :  { %v4157_v50 = vpop.f32.mrb[81].mxu0  ;;  %v2054_v28 = vmul.f32 %v4154_v32, %v4154_v32 }
 0x67f   :  { %v2014_v45 = vadd.f32 %v2013_v6, %v4157_v50  ;;  %v2052_v30 = vmul.f32 %v4157_v50, %v4157_v50  ;;  %v2082_v42 = vadd.f32 %v2081_v36, %v2051_v14  ;;  %v4162_v2 = vpop.f32.mrb[82].mxu0 }
 0x680   :  { %v4164_v9 = vpop.f32.mrb[83].mxu0  ;;  %v2055_v17 = vmul.f32 %v4162_v2, %v4162_v2 }
 0x681   :  { %v2083_v34 = vadd.f32 %v2082_v42, %v2052_v30  ;;  %v2015_v19 = vadd.f32 %v2014_v45, %v4164_v9  ;;  %v2053_v27 = vmul.f32 %v4164_v9, %v4164_v9 }
 0x683   :  { %v2016_v0 = vadd.f32 %v4154_v32, %v2015_v19  ;;  %v2084_v25 = vadd.f32 %v2083_v34, %v2053_v27 }
 0x685   :  { %v2085_v24 = vadd.f32 %v2084_v25, %v2054_v28  ;;  %v4174_v18 = vpop.f32.mrb[84].mxu0  ;;  %v2017_v46 = vadd.f32 %v4162_v2, %v2016_v0  ;;  %v4226_v25 = vpop.permute.xlu1 %2273 }
 0x686   :  { %v4177_v44 = vpop.f32.mrb[85].mxu0  ;;  %v2058_v13 = vmul.f32 %v4174_v18, %v4174_v18 }
 0x687   :  { %v2018_v48 = vadd.f32 %v2017_v46, %v4177_v44  ;;  %v2056_v49 = vmul.f32 %v4177_v44, %v4177_v44  ;;  %v2086_v4 = vadd.f32 %v2085_v24, %v2055_v17  ;;  %v4182_v23 = vpop.f32.mrb[86].mxu0 }
 0x688   :  { %v4184_v31 = vpop.f32.mrb[87].mxu0  ;;  %v2059_v37 = vmul.f32 %v4182_v23, %v4182_v23 }
 0x689   :  { %v2087_v38 = vadd.f32 %v2086_v4, %v2056_v49  ;;  %v2019_v55 = vadd.f32 %v2018_v48, %v4184_v31  ;;  %v2057_v57 = vmul.f32 %v4184_v31, %v4184_v31 }
 0x68b   :  { %v2020_v61 = vadd.f32 %v4174_v18, %v2019_v55  ;;  %v2088_v62 = vadd.f32 %v2087_v38, %v2057_v57  ;;  %v4231_v55 = vpop.permute.xlu0 %2258 }
 0x68d   :  { %v2089_v52 = vadd.f32 %v2088_v62, %v2058_v13  ;;  %v4194_v63 = vpop.f32.mrb[88].mxu0  ;;  %v2021_v5 = vadd.f32 %v4182_v23, %v2020_v61  ;;  %v4236_v62 = vpop.permute.xlu1 %2338 }
 0x68e   :  { %v4197_v59 = vpop.f32.mrb[89].mxu0  ;;  %v2062_v39 = vmul.f32 %v4194_v63, %v4194_v63 }
 0x68f   :  { %v2022_v21 = vadd.f32 %v2021_v5, %v4197_v59  ;;  %v2060_v60 = vmul.f32 %v4197_v59, %v4197_v59  ;;  %v2090_v56 = vadd.f32 %v2089_v52, %v2059_v37  ;;  %v4202_v12 = vpop.f32.mrb[90].mxu0 }
 0x690   :  { %v4204_v22 = vpop.f32.mrb[91].mxu0  ;;  %v2063_v6 = vmul.f32 %v4202_v12, %v4202_v12 }
 0x691   :  { %v2091_v51 = vadd.f32 %v2090_v56, %v2060_v60  ;;  %v2023_v8 = vadd.f32 %v2022_v21, %v4204_v22  ;;  %v2061_v10 = vmul.f32 %v4204_v22, %v4204_v22  ;;  %v4238_v60 = vpop.permute.xlu0 %2263 }
 0x693   :  { %v2024_v14 = vadd.f32 %v4194_v63, %v2023_v8  ;;  %v2092_v36 = vadd.f32 %v2091_v51, %v2061_v10  ;;  %v4240_v8 = vpop.permute.xlu1 %2348 }
 0x695   :  { %v2093_v45 = vadd.f32 %v2092_v36, %v2062_v39  ;;  %v4216_v30 = vpop.f32.mrb[92].mxu0  ;;  %v2025_v42 = vadd.f32 %v4202_v12, %v2024_v14 }
 0x696   :  { %v4219_v34 = vpop.f32.mrb[93].mxu0  ;;  %v2066_v49 = vmul.f32 %v4216_v30, %v4216_v30 }
 0x697   :  { %v2026_v19 = vadd.f32 %v2025_v42, %v4219_v34  ;;  %v2064_v27 = vmul.f32 %v4219_v34, %v4219_v34  ;;  %v2094_v28 = vadd.f32 %v2093_v45, %v2063_v6  ;;  %v4224_v0 = vpop.f32.mrb[94].mxu0  ;;  %v4242_v6 = vpop.permute.xlu0 %2278 }
 0x698   :  { %v1987_v17 = vpop.f32.mrb[95].mxu0  ;;  %v2067_v57 = vmul.f32 %v4224_v0, %v4224_v0 }
 0x699   :  { %v2095_v24 = vadd.f32 %v2094_v28, %v2064_v27  ;;  %v2027_v46 = vadd.f32 %v2026_v19, %v1987_v17  ;;  %v2065_v48 = vmul.f32 %v1987_v17, %v1987_v17  ;;  %v4244_v19 = vpop.permute.xlu1 %2358 }
 0x69b   :  { %v2028_v4 = vadd.f32 %v4216_v30, %v2027_v46  ;;  %v2096_v38 = vadd.f32 %v2095_v24, %v2065_v48  ;;  %v4246_v48 = vpop.permute.xlu0 %2343 }
 0x69d   :  { %v2029_v13 = vadd.f32 %v4224_v0, %v2028_v4  ;;  %v2097_v61 = vadd.f32 %v2096_v38, %v2066_v49  ;;  %v4248_v4 = vpop.permute.xlu1 %2363 }
 0x69f   :  { %v2030_v37 = vrot.slane %v2029_v13, 4  ;;  %v2098_v52 = vadd.f32 %v2097_v61, %v2067_v57  ;;  %v4250_v57 = vpop.permute.xlu0 %2353 }
 0x6a1   :  { %v2031_v5 = vadd.f32 %v2030_v37, %v2029_v13  ;;  %v2099_v21 = vrot.slane %v2098_v52, 4  ;;  %v4252_v13 = vpop.permute.xlu1 %2368  ;;  %v2109_v37 = vld [vmem:[%s4453_s9] sm:$0x1]  ;;  %s3126_s9 = smov [#allocation2]  }
 0x6a3   :  { %v2032_v56 = vrot.slane %v2031_v5, 2  ;;  %v2100_v51 = vadd.f32 %v2099_v21, %v2098_v52  ;;  %v4254_v61 = vpop.permute.xlu0 %2283 }
 0x6a5   :  { %v2033_v10 = vadd.f32 %v2032_v56, %v2031_v5  ;;  %v2101_v39 = vrot.slane %v2100_v51, 2  ;;  %v4259_v52 = vpop.permute.xlu1 %2373  ;;  %v2113_v56 = vld [vmem:[%s4454_s10] sm:$0x1]  ;;  %s2502_s10 = sshll.u32 %s3126_s9, 4  ;;  %s2503_s10 = int_to_ptr.vmem [resolvable:$true] %s2502_s10 }
 0x6a6   :  { %s3101_s17 = scalar_lea.vmem %s2503_s10, 32  ;;  %p3106_p1 = scmp.lt.s32.totalorder %s2503_s10, %s2503_s10 }
 0x6a7   :  { %v2034_v14 = vrot.slane %v2033_v10, 1  ;;  %v2102_v36 = vadd.f32 %v2101_v39, %v2100_v51  ;;  %v4265_v39 = vpop.permute.xlu0 %2288  ;;  %p3102_p0 = scmp.ne.s32.totalorder %s2503_s10, %s3101_s17  ;;  %p3107_p2 = scmp.lt.s32.totalorder %s3101_s17, %s3101_s17 }
 0x6a9   :  { %v2035_v45 = vadd.f32 %v2034_v14, %v2033_v10  ;;  %v2103_v42 = vrot.slane %v2102_v36, 1  ;;  %v4267_v14 = vpop.permute.xlu1 %2378  ;;  %p3108_p3 = por %p3107_p2, %p3106_p1 }
 0x6ab   :  { %v2104_v27 = vadd.f32 %v2103_v42, %v2102_v36  ;;  %v2105_v28 = vmul.f32 0.0625, %v2035_v45  ;;  %p3109_p4 = pnand %p3108_p3, %p3102_p0 }
 0x6ad   :  { %v2106_v24 = vmul.f32 0.0625, %v2104_v27  ;;  %v2107_v46 = vmul.f32 %v2105_v28, %v2105_v28 }
 0x6af   :  { %v2108_v49 = vsub.f32 %v2106_v24, %v2107_v46 }
 0x6b1   :  { %v2110_v38 = vadd.f32 1e-05, %v2108_v49 }
 0x6b3   :  { %3083 = vrsqrt.f32 %v2110_v38 }
 0x6bd   :  { %v3084_v5 = vpop.eup %3083 }
 0x6be   :  { %v2112_v21 = vmul.f32 %v3084_v5, %v2109_v37 }
 0x6c0   :  { %v2114_v51 = vmul.f32 %v2112_v21, %v2105_v28  ;;  %v2120_v10 = vrot.slane %v2112_v21, %v3577_v41 }
 0x6c2   :  { %v2115_v36 = vsub.f32 %v2113_v56, %v2114_v51  ;;  %v4269_v45 = vmul.f32 %v2120_v10, %v1987_v17  ;;  %v2122_v42 = vmul.f32 %v2120_v10, %v4077_v43  ;;  %v2123_v27 = vmul.f32 %v2120_v10, %v4081_v33 }
 0x6c3   :  { %v2124_v24 = vmul.f32 %v4075_v53, %v2120_v10  ;;  %v2125_v46 = vmul.f32 %v4079_v11, %v2120_v10  ;;  %v2126_v49 = vmul.f32 %v2120_v10, %v4097_v35  ;;  %v4277_v28 = vmul.f32 %v2120_v10, %v4104_v7 }
 0x6c4   :  { %v4280_v38 = vrot.slane %v2115_v36, %v3577_v41  ;;  %v2128_v37 = vmul.f32 %v4094_v3, %v2120_v10  ;;  %v2129_v17 = vmul.f32 %v4102_v16, %v2120_v10  ;;  %v2130_v43 = vmul.f32 %v2120_v10, %v4117_v47  ;;  %v4301_v47 = vpop.permute.xlu0 %2293 }
 0x6c5   :  { %v2131_v33 = vmul.f32 %v2120_v10, %v4124_v1  ;;  %v2132_v53 = vmul.f32 %v4114_v29, %v2120_v10  ;;  %v2133_v11 = vmul.f32 %v4122_v15, %v2120_v10  ;;  %v4289_v35 = vmul.f32 %v2120_v10, %v4137_v26  ;;  %4472 = vst [vmem:[#allocation5_spill] sm:$0xff] %v4301_v47 }
 0x6c6   :  { %v4292_v7 = vmul.f32 %v2120_v10, %v4144_v54  ;;  %v4295_v41 = vmul.f32 %v4134_v40, %v2120_v10  ;;  %v4298_v3 = vmul.f32 %v4142_v20, %v2120_v10  ;;  %v2138_v16 = vmul.f32 %v2120_v10, %v4157_v50  ;;  %v4307_v54 = vpop.permute.xlu1 %2383 }
 0x6c7   :  { %v2139_v29 = vmul.f32 %v2120_v10, %v4164_v9  ;;  %v2140_v15 = vmul.f32 %v4154_v32, %v2120_v10  ;;  %v2141_v1 = vmul.f32 %v4162_v2, %v2120_v10  ;;  %v2142_v26 = vmul.f32 %v2120_v10, %v4177_v44 }
 0x6c8   :  { %v2143_v40 = vmul.f32 %v2120_v10, %v4184_v31  ;;  %v2144_v5 = vmul.f32 %v4174_v18, %v2120_v10  ;;  %v2145_v20 = vmul.f32 %v4182_v23, %v2120_v10  ;;  %v2146_v50 = vmul.f32 %v2120_v10, %v4197_v59  ;;  %v4337_v51 = vpop.permute.xlu0 %2298 }
 0x6c9   :  { %v2147_v21 = vmul.f32 %v2120_v10, %v4204_v22  ;;  %v2148_v9 = vmul.f32 %v4194_v63, %v2120_v10  ;;  %v2149_v32 = vmul.f32 %v4202_v12, %v2120_v10  ;;  %v4317_v2 = vmul.f32 %v2120_v10, %v4219_v34  ;;  %4473 = vst [vmem:[#allocation6_spill] sm:$0xff] %v4337_v51 }
 0x6ca   :  { %v4320_v44 = vmul.f32 %v4216_v30, %v2120_v10  ;;  %v4323_v31 = vmul.f32 %v4224_v0, %v2120_v10  ;;  %v2176_v18 = vadd.f32 %v4280_v38, %v2138_v16  ;;  %v2177_v23 = vadd.f32 %v4280_v38, %v2139_v29 }
 0x6cb   :  { %v2178_v59 = vadd.f32 %v4280_v38, %v2140_v15  ;;  %v2179_v22 = vadd.f32 %v4280_v38, %v2141_v1  ;;  %v2180_v63 = vadd.f32 %v4280_v38, %v2142_v26  ;;  %v2181_v12 = vadd.f32 %v4280_v38, %v2143_v40  ;;  %v4345_v15 = vpop.permute.xlu1 %2388 }
 0x6cc   :  { %v2182_v34 = vadd.f32 %v4280_v38, %v2144_v5  ;;  %v2183_v30 = vadd.f32 %v4280_v38, %v2145_v20  ;;  %v2184_v56 = vadd.f32 %v4280_v38, %v2146_v50  ;;  %v4335_v0 = vadd.f32 %v4280_v38, %v2147_v21  ;;  %v4349_v51 = vpop.permute.xlu0 %2303 }
 0x6cd   :  { %v4340_v10 = vadd.f32 %v4280_v38, %v2148_v9  ;;  %v4343_v36 = vadd.f32 %v4280_v38, %v2149_v32  ;;  %v2208_v16 = vmax.f32 %v2176_v18, 0.0  ;;  %v2209_v29 = vmax.f32 %v2177_v23, 0.0 }
 0x6ce   :  { %v2210_v1 = vmax.f32 %v2178_v59, 0.0  ;;  %v2211_v26 = vmax.f32 %v2179_v22, 0.0  ;;  %v2212_v20 = vmax.f32 %v2180_v63, 0.0  ;;  %v2213_v50 = vmax.f32 %v2181_v12, 0.0 }
 0x6cf   :  { %v2432_v40 = vmul.f32 %v4236_v62, %v2208_v16  ;;  %v2433_v5 = vmul.f32 %v4246_v48, %v2209_v29  ;;  %v2214_v21 = vmax.f32 %v2182_v34, 0.0  ;;  %v2160_v18 = vadd.f32 %v4280_v38, %v2122_v42  ;;  %v4354_v23 = vpop.permute.xlu1 %2393 }
 0x6d0   :  { %v2434_v9 = vmul.f32 %v4240_v8, %v2210_v1  ;;  %v2435_v32 = vmul.f32 %v4250_v57, %v2211_v26  ;;  %v2161_v59 = vadd.f32 %v4280_v38, %v2123_v27  ;;  %v2162_v62 = vadd.f32 %v4280_v38, %v2124_v24 }
 0x6d1   :  { %v2469_v47 = vadd.f32 %v2433_v5, %v2432_v40  ;;  %v2163_v48 = vadd.f32 %v4280_v38, %v2125_v46  ;;  %v2164_v22 = vadd.f32 %v4280_v38, %v2126_v49  ;;  %v2165_v12 = vadd.f32 %v4280_v38, %v4277_v28 }
 0x6d2   :  { %v2166_v8 = vadd.f32 %v4280_v38, %v2128_v37  ;;  %v4364_v57 = vadd.f32 %v4280_v38, %v2129_v17  ;;  %v4367_v42 = vadd.f32 %v4280_v38, %v2130_v43  ;;  %v4370_v27 = vadd.f32 %v4280_v38, %v2131_v33  ;;  %v4379_v17 = vpop.permute.xlu0 %2308 }
 0x6d3   :  { %v2470_v63 = vadd.f32 %v2469_v47, %v2434_v9  ;;  %v4373_v24 = vadd.f32 %v4280_v38, %v2132_v53  ;;  %v4376_v46 = vadd.f32 %v4280_v38, %v2133_v11  ;;  %v2436_v49 = vmul.f32 %v4244_v19, %v2212_v20  ;;  %v2399_v26 = vpop.permute.xlu1 %2398 }
 0x6d4   :  { %v2192_v47 = vmax.f32 %v2160_v18, 0.0  ;;  %v2193_v37 = vmax.f32 %v2161_v59, 0.0  ;;  %v2215_v34 = vmax.f32 %v2183_v30, 0.0  ;;  %v2216_v16 = vmax.f32 %v2184_v56, 0.0 }
 0x6d5   :  { %v2471_v28 = vadd.f32 %v2470_v63, %v2435_v32  ;;  %v2437_v43 = vmul.f32 %v4248_v4, %v2213_v50  ;;  %v2194_v33 = vmax.f32 %v2162_v62, 0.0  ;;  %v2438_v11 = vmul.f32 %v4252_v13, %v2214_v21 }
 0x6d6   :  { %v2416_v1 = vmul.f32 %v4231_v55, %v2192_v47  ;;  %v2417_v53 = vmul.f32 %v4238_v60, %v2193_v37  ;;  %v2217_v19 = vmax.f32 %v4335_v0, 0.0  ;;  %v2218_v5 = vmax.f32 %v4340_v10, 0.0 }
 0x6d7   :  { %v2472_v29 = vadd.f32 %v2471_v28, %v2436_v49  ;;  %v2439_v30 = vmul.f32 %v4259_v52, %v2215_v34  ;;  %v2195_v20 = vmax.f32 %v2163_v48, 0.0  ;;  %v2440_v56 = vmul.f32 %v4267_v14, %v2216_v16  ;;  %v2314_v52 = vpop.permute.xlu0 %2313  ;;  %v2404_v18 = vpop.permute.xlu1 %2403 }
 0x6d8   :  { %v2196_v50 = vmax.f32 %v2164_v22, 0.0  ;;  %v2418_v9 = vmul.f32 %v4209_v58, %v2194_v33  ;;  %v2448_v55 = vadd.f32 %v2417_v53, %v2416_v1  ;;  %v2188_v60 = vadd.f32 %v4280_v38, %v4317_v2 }
 0x6d9   :  { %v2473_v40 = vadd.f32 %v2472_v29, %v2437_v43  ;;  %v4394_v13 = vadd.f32 %v4280_v38, %v4289_v35  ;;  %v2189_v0 = vadd.f32 %v4280_v38, %v4269_v45  ;;  %v4400_v14 = vadd.f32 %v4280_v38, %v4292_v7 }
 0x6da   :  { %v2190_v58 = vadd.f32 %v4280_v38, %v4320_v44  ;;  %v4406_v21 = vadd.f32 %v4280_v38, %v4295_v41  ;;  %v2197_v2 = vmax.f32 %v2165_v12, 0.0  ;;  %v2419_v35 = vmul.f32 %v4226_v25, %v2195_v20 }
 0x6db   :  { %v2474_v4 = vadd.f32 %v2473_v40, %v2438_v11  ;;  %v2449_v32 = vadd.f32 %v2448_v55, %v2418_v9  ;;  %v2219_v45 = vmax.f32 %v4343_v36, 0.0  ;;  %v2441_v59 = vmul.f32 %v4307_v54, %v2217_v19  ;;  %v2409_v34 = vpop.permute.xlu1 %2408  ;;  %v4475_v11 = vld [vmem:[#allocation6_spill] sm:$0xff] }
 0x6dc   :  { %v2198_v48 = vmax.f32 %v2166_v8, 0.0  ;;  %v2420_v7 = vmul.f32 %v4242_v6, %v2196_v50  ;;  %v2442_v44 = vmul.f32 %v4345_v15, %v2218_v5  ;;  %v2199_v41 = vmax.f32 %v4364_v57, 0.0  ;;  %v2319_v6 = vpop.permute.xlu0 %2318 }
 0x6dd   :  { %v2475_v10 = vadd.f32 %v2474_v4, %v2439_v30  ;;  %v2450_v22 = vadd.f32 %v2449_v32, %v2419_v35  ;;  %v2220_v49 = vmax.f32 %v2188_v60, 0.0  ;;  %v2421_v12 = vmul.f32 %v4254_v61, %v2197_v2 }
 0x6de   :  { %v2191_v28 = vadd.f32 %v4280_v38, %v4323_v31  ;;  %v2175_v54 = vadd.f32 %v4280_v38, %v4298_v3  ;;  %v2443_v36 = vmul.f32 %v4354_v23, %v2219_v45  ;;  %v2221_v47 = vmax.f32 %v2189_v0, 0.0  ;;  %v4474_v31 = vld [vmem:[#allocation5_spill] sm:$0xff] }
 0x6df   :  { %v2476_v62 = vadd.f32 %v2475_v10, %v2440_v56  ;;  %v2451_v25 = vadd.f32 %v2450_v22, %v2420_v7  ;;  %v2200_v15 = vmax.f32 %v4367_v42, 0.0  ;;  %v2422_v37 = vmul.f32 %v4265_v39, %v2198_v48 }
 0x6e0   :  { %v2444_v61 = vmul.f32 %v2399_v26, %v2220_v49  ;;  %v2222_v43 = vmax.f32 %v2190_v58, 0.0  ;;  %v2201_v29 = vmax.f32 %v4370_v27, 0.0  ;;  %v2423_v33 = vmul.f32 %v4474_v31, %v2199_v41  ;;  %v2324_v39 = vpop.permute.xlu0 %2323  ;;  %v2414_v27 = vpop.permute.xlu1 %2413 }
 0x6e1   :  { %v2477_v63 = vadd.f32 %v2476_v62, %v2441_v59  ;;  %v2452_v57 = vadd.f32 %v2451_v25, %v2421_v12  ;;  %v2445_v3 = vmul.f32 %v2404_v18, %v2221_v47  ;;  %v2223_v23 = vmax.f32 %v2191_v28, 0.0 }
 0x6e2   :  { %v2202_v53 = vmax.f32 %v4373_v24, 0.0  ;;  %v2424_v40 = vmul.f32 %v4475_v11, %v2200_v15  ;;  %v2446_v5 = vmul.f32 %v2409_v34, %v2222_v43  ;;  %v2203_v30 = vmax.f32 %v4376_v46, 0.0 }
 0x6e3   :  { %v2478_v8 = vadd.f32 %v2477_v63, %v2442_v44  ;;  %v2453_v1 = vadd.f32 %v2452_v57, %v2422_v37  ;;  %v2425_v26 = vmul.f32 %v4349_v51, %v2201_v29  ;;  %v2447_v4 = vmul.f32 %v2414_v27, %v2223_v23 }
 0x6e4   :  { %v2426_v50 = vmul.f32 %v4379_v17, %v2202_v53  ;;  %v2204_v55 = vmax.f32 %v4394_v13, 0.0  ;;  %v2427_v60 = vmul.f32 %v2314_v52, %v2203_v30  ;;  %v2205_v10 = vmax.f32 %v4400_v14, 0.0  ;;  %v2329_v58 = vpop.permute.xlu0 %2328 }
 0x6e5   :  { %v2479_v16 = vadd.f32 %v2478_v8, %v2443_v36  ;;  %v2454_v42 = vadd.f32 %v2453_v1, %v2423_v33  ;;  %v2206_v51 = vmax.f32 %v4406_v21, 0.0  ;;  %v2207_v59 = vmax.f32 %v2175_v54, 0.0 }
 0x6e6   :  { %v2428_v46 = vmul.f32 %v2319_v6, %v2204_v55  ;;  %v2429_v18 = vmul.f32 %v2324_v39, %v2205_v10 }
 0x6e7   :  { %v2480_v38 = vadd.f32 %v2479_v16, %v2444_v61  ;;  %v2455_v20 = vadd.f32 %v2454_v42, %v2424_v40  ;;  %v2430_v17 = vmul.f32 %v2329_v58, %v2206_v51 }
 0x6e8   :  { %v2334_v48 = vpop.permute.xlu0 %2333 }
 0x6e9   :  { %v2481_v19 = vadd.f32 %v2480_v38, %v2445_v3  ;;  %v2456_v9 = vadd.f32 %v2455_v20, %v2425_v26  ;;  %v2431_v22 = vmul.f32 %v2334_v48, %v2207_v59 }
 0x6eb   :  { %v2482_v56 = vadd.f32 %v2481_v19, %v2446_v5  ;;  %v2457_v0 = vadd.f32 %v2456_v9, %v2426_v50 }
 0x6ed   :  { %v2483_v24 = vadd.f32 %v2482_v56, %v2447_v4  ;;  %v2458_v35 = vadd.f32 %v2457_v0, %v2427_v60 }
 0x6ef   :  { %v2484_v2 = vrot.slane %v2483_v24, 4  ;;  %v2459_v32 = vadd.f32 %v2458_v35, %v2428_v46 }
 0x6f1   :  { %v2485_v45 = vadd.f32 %v2484_v2, %v2483_v24  ;;  %v2460_v62 = vadd.f32 %v2459_v32, %v2429_v18 }
 0x6f3   :  { %v2461_v7 = vadd.f32 %v2460_v62, %v2430_v17  ;;  %v2486_v13 = vrot.slane %v2485_v45, 2 }
 0x6f5   :  { %v2462_v52 = vadd.f32 %v2461_v7, %v2431_v22  ;;  %v2487_v44 = vadd.f32 %v2486_v13, %v2485_v45 }
 0x6f7   :  { %v2463_v63 = vrot.slane %v2462_v52, 4  ;;  %v2488_v49 = vrot.slane %v2487_v44, 1 }
 0x6f9   :  { %v2464_v14 = vadd.f32 %v2463_v63, %v2462_v52  ;;  %v2489_v28 = vadd.f32 %v2488_v49, %v2487_v44 }
 0x6fb   :  { %v2465_v41 = vrot.slane %v2464_v14, 2 }
 0x6fd   :  { %v2466_v12 = vadd.f32 %v2465_v41, %v2464_v14 }
 0x6ff   :  { %v2467_v25 = vrot.slane %v2466_v12, 1 }
 0x701   :  { %v2468_v21 = vadd.f32 %v2467_v25, %v2466_v12 }
 0x703   :  { %v2493_v54 = vsel %vm2492_vm1, %v2489_v28, %v2468_v21 }
 0x704   :  { %2495 = vst [vmem:[#allocation2] sm:$0x3] %v2493_v54 }
 0x705   :  { %3112 = shalt.err (!%p3109_p4)
}
 0x706   :  { %s3113_s20 = scalar_lea.hbm %s4456_s12, 32 }
 0x707   :  { %p3114_p5 = scmp.ne.s32.totalorder %s4456_s12, %s3113_s20  ;;  %p3117_p6 = scmp.lt.u32.totalorder %s3113_s20, %s4456_s12 }
 0x709   :  { %p3119_p7 = pnand %p3117_p6, %p3114_p5 }
 0x70b   :  { %3122 = shalt.err (!%p3119_p7)
}
 0x70c   :  { %2505 = dma.vmem_to_hbm [thread:$0]  %s2503_s10, 32, %s4456_s12, [#allocation3]  }
 0x70d   :  { %3123 = dma.done.wait [#allocation3], 32  }
 0x70e   :  { %3124 = vsyncadd [#allocation3], 4294967264 }
 0x70f   :  { %2509 = vsyncpa [#allocation3], 1 }

</bundles_post_ra>
